<compile_context>
chip_gen: v7x
topology: tpu7x:2x2x1
jax: 0.10.0
libtpu: 0.0.40
codegen_flags: <defaults>
</compile_context>

<pallas_src>
import functools

import jax
import jax.numpy as jnp
from jax.experimental import pallas as pl
from jax.experimental.pallas import tpu as pltpu


def _round_up(x, m):
    return (x + m - 1) // m * m


# ----------------------------- hardware queries -------------------------------

def _tpu_topology():
    """Returns (tensorcores_per_device, per_core_vmem_bytes), with safe fallbacks."""
    vmem = 64 * 2**20          # smallest per-TC VMEM across v5e/v6e/v7x
    n_tc = 1
    try:
        info = pltpu.get_tpu_info()
        v = getattr(info, "vmem_capacity_bytes", None)
        if v:
            vmem = int(v)
        for attr in ("num_tensorcores", "tensorcores_per_chip"):
            n = getattr(info, attr, None)
            if isinstance(n, int) and n > 0:
                n_tc = n
                break
    except Exception:
        pass
    if n_tc == 1:
        # Heuristic fallback: v7x has 2 TensorCores per device.
        try:
            kind = (jax.devices()[0].device_kind or "").lower()
            if "v7" in kind:
                n_tc = 2
        except Exception:
            pass
    return n_tc, vmem


# --------------------------------- kernel ------------------------------------

def _lstm_kernel(z_ref, wh_ref, h0_ref, c0_ref, h_out_ref, c_sc,
                 *, hidden_pad, t_chunk, tail_len, unroll):
    """Grid = (batch_tiles, time_chunks). One invocation = one time chunk.

    NOTE: the recurrence carry (h lives in the VMEM-resident output block, c in
    the scratch) requires the TIME axis to be the innermost (fastest-varying)
    grid axis: grid=(n_btiles, n_chunks) with program_id(1) == time chunk.
    Do not reorder the grid.
    """
    tc = pl.program_id(1)               # time-chunk index (serial, "arbitrary")
    n_chunks = pl.num_programs(1)

    # Initialize recurrent state for this batch tile at the first time chunk.
    @pl.when(tc == 0)
    def _():
        h_out_ref[...] = h0_ref[...]
        c_sc[...] = c0_ref[...]

    Hp = hidden_pad
    wh = wh_ref[...]                    # (Hp, 4*Hp), bf16 by default

    # TODO(synk): drive the MXU weight-stationary (pltpu.matmul_push_rhs once
    # per chunk + matmul_acc_lhs/matmul_pop per step) to avoid re-pushing Wh
    # for every tiny (b_tile x Hp) LHS; keeping jnp.dot here for portability.
    def step(s, carry):
        h, c = carry
        z = z_ref[s].astype(jnp.float32)            # (b_tile, 4*Hp)
        gates = z + jnp.dot(h.astype(wh.dtype), wh,
                            preferred_element_type=jnp.float32)
        g = jnp.tanh(gates[:, :Hp])
        # Fused sigmoid for the contiguous i|f|o slab: 1 wide EUP push.
        ifo = 0.5 * (jnp.tanh(0.5 * gates[:, Hp:]) + 1.0)
        i = ifo[:, 0 * Hp:1 * Hp]
        f = ifo[:, 1 * Hp:2 * Hp]
        o = ifo[:, 2 * Hp:3 * Hp]
        c_new = g * i + c * f
        h_new = jnp.tanh(c_new) * o
        return h_new, c_new

    def run(n_steps):
        h, c = jax.lax.fori_loop(0, n_steps, step,
                                 (h_out_ref[...], c_sc[...]),
                                 unroll=min(unroll, n_steps))
        h_out_ref[...] = h              # output block index constant over tc:
        c_sc[...] = c                   # stays VMEM-resident, acts as h carry

    if tail_len == 0:
        # Every chunk is full: no masking, no branch.
        run(t_chunk)
    else:
        # Only the final chunk is partial; it runs a shorter unmasked loop.
        @pl.when(tc < n_chunks - 1)
        def _():
            run(t_chunk)

        @pl.when(tc == n_chunks - 1)
        def _():
            run(tail_len)


# -------------------------------- wrapper -------------------------------------

def _pad_gate_cols(w, hidden, hidden_pad):
    """(rows, 4*H) -> (rows, 4*Hp): gate k placed at columns [k*Hp, k*Hp+H)."""
    rows = w.shape[0]
    out = jnp.zeros((rows, 4 * hidden_pad), w.dtype)
    for k in range(4):
        out = out.at[:, k * hidden_pad:k * hidden_pad + hidden].set(
            w[:, k * hidden:(k + 1) * hidden])
    return out


def lstm_cell_forward(x, c0, h0, Wx_t, Wh_t, b_t, *, t_chunk=32,
                      use_bf16_matmul=True):
    """Runs the full LSTM recurrence.

    x    : (batch, time, embed)   float32
    c0,h0: (hidden, batch)        float32   (PyTorch layout)
    Wx_t : (embed,  4*hidden)     = concat([W_gx,W_ix,W_fx,W_ox], 0).T
    Wh_t : (hidden, 4*hidden)     = concat([W_gh,W_ih,W_fh,W_oh], 0).T
    b_t  : (1,      4*hidden)     = concat([b_g,b_i,b_f,b_o], 0).T

    Returns h of shape (hidden, batch), matching the PyTorch module.
    """
    batch, time, embed = x.shape
    hidden = Wh_t.shape[0]

    n_tc, vmem_cap = _tpu_topology()
    compute_dtype = jnp.bfloat16 if use_bf16_matmul else jnp.float32
    cbytes = 2 if use_bf16_matmul else 4

    # Lane/sublane-aligned padded sizes.
    Bp = _round_up(batch, 8)
    Hp = _round_up(hidden, 128)

    # Batch split across TensorCores: only when the chip actually has >=2 TCs
    # (v7x). On 1-TC v5e/v6e a split would just double the serial grid steps.
    if n_tc >= 2 and Bp >= 16 and Bp % 16 == 0:
        n_btiles, b_tile = 2, Bp // 2
    else:
        n_btiles, b_tile = 1, Bp

    # VMEM-aware t_chunk: shrink until the working set fits the chip's VMEM.
    headroom = 8 * 2**20
    usable = max(16 * 2**20, vmem_cap - headroom)
    t_chunk = max(1, min(t_chunk, time))
    while True:
        z_bytes = 2 * t_chunk * b_tile * 4 * Hp * cbytes   # double-buffered Z
        wh_bytes = Hp * 4 * Hp * cbytes                    # single-buffered Wh
        state_bytes = 8 * b_tile * Hp * 4                  # h0/c0/out/scratch
        est = z_bytes + wh_bytes + state_bytes + (2 << 20)
        if est <= usable or t_chunk <= 4:
            break
        t_chunk = max(4, t_chunk // 2)
    vmem_limit = int(min(usable, max(32 * 2**20, int(1.25 * est))))

    n_chunks = pl.cdiv(time, t_chunk)
    T_pad = n_chunks * t_chunk
    tail_len = time % t_chunk
    unroll = 8 if Hp <= 512 else 4

    # Gate-aligned padded parameters (padding zeroed so padded lanes can never
    # feed back into valid state).
    Wx_pad = _pad_gate_cols(Wx_t, hidden, Hp).astype(compute_dtype)   # (E,4Hp)
    b_pad = _pad_gate_cols(b_t, hidden, Hp)                           # (1,4Hp) f32
    Wh_pad = jnp.zeros((Hp, 4 * Hp), jnp.float32)
    Wh_pad = Wh_pad.at[:hidden, :].set(_pad_gate_cols(Wh_t, hidden, Hp))
    Wh_pad = Wh_pad.astype(compute_dtype)

    # Hoisted input projection. x (small) is padded + transposed to time-major
    # FIRST, so Z is produced directly in its final layout: no jnp.pad or
    # transpose of the big (T,B,4Hp) tensor, and only one HBM write of it.
    x_p = jnp.zeros((Bp, T_pad, embed), compute_dtype)
    x_p = x_p.at[:batch, :time, :].set(x.astype(compute_dtype))
    x_tm = jnp.transpose(x_p, (1, 0, 2))                              # (T,Bp,E)
    Z = jnp.einsum('tbe,eg->tbg', x_tm, Wx_pad,
                   preferred_element_type=jnp.float32) + b_pad        # f32 acc
    Z = Z.astype(compute_dtype)                                       # bf16 stream

    # Padded initial state, batch-major (carried in f32).
    h0_p = jnp.zeros((Bp, Hp), jnp.float32).at[:batch, :hidden].set(h0.T)
    c0_p = jnp.zeros((Bp, Hp), jnp.float32).at[:batch, :hidden].set(c0.T)

    kernel = functools.partial(_lstm_kernel, hidden_pad=Hp, t_chunk=t_chunk,
                               tail_len=tail_len, unroll=unroll)

    # TODO(synk): on v7x verify the "parallel" batch axis actually shards
    # across both TensorCores; if not, switch to pltpu.CORE_PARALLEL.
    h_final_pad = pl.pallas_call(
        kernel,
        out_shape=jax.ShapeDtypeStruct((Bp, Hp), jnp.float32),
        grid_spec=pltpu.PrefetchScalarGridSpec(
            num_scalar_prefetch=0,
            grid=(n_btiles, n_chunks),          # time MUST stay innermost
            in_specs=[
                # Z: one (t_chunk, b_tile, 4*Hp) slab per grid step.
                pl.BlockSpec((t_chunk, b_tile, 4 * Hp),
                             lambda b, t: (t, b, 0)),
                # Wh: grid-invariant, whole array resident once in VMEM
                # (untiled -> single copy, no double buffering).
                pl.BlockSpec(memory_space=pltpu.MemorySpace.VMEM),
                pl.BlockSpec((b_tile, Hp), lambda b, t: (b, 0)),     # h0
                pl.BlockSpec((b_tile, Hp), lambda b, t: (b, 0)),     # c0
            ],
            out_specs=pl.BlockSpec((b_tile, Hp), lambda b, t: (b, 0)),
            scratch_shapes=[
                pltpu.VMEM((b_tile, Hp), jnp.float32),               # c carry
            ],
        ),
        compiler_params=pltpu.CompilerParams(
            dimension_semantics=("parallel", "arbitrary"),
            vmem_limit_bytes=vmem_limit,
        ),
    )(Z, Wh_pad, h0_p, c0_p)

    # Back to the PyTorch convention (hidden, batch).
    return h_final_pad[:batch, :hidden].T


# ----------------------- parameter construction (plain JAX) -------------------

def kaiming_normal(key, dim_1, dim_2, nonlin="linear"):
    # torch.nn.init.kaiming_normal_: std = gain / sqrt(fan_in), fan_in = dim_2.
    gain = 5.0 / 3.0 if nonlin == "tanh" else 1.0
    std = gain / jnp.sqrt(jnp.float32(dim_2))
    return jax.random.normal(key, (dim_1, dim_2), dtype=jnp.float32) * std


def make_params(key, input_dim, hidden_dim):
    ks = jax.random.split(key, 8)
    W_gx = kaiming_normal(ks[0], hidden_dim, input_dim, "linear")
    W_ix = kaiming_normal(ks[1], hidden_dim, input_dim, "linear")
    W_fx = kaiming_normal(ks[2], hidden_dim, input_dim, "linear")
    W_ox = kaiming_normal(ks[3], hidden_dim, input_dim, "linear")
    W_gh = kaiming_normal(ks[4], hidden_dim, hidden_dim, "tanh")
    W_ih = kaiming_normal(ks[5], hidden_dim, hidden_dim, "tanh")
    W_fh = kaiming_normal(ks[6], hidden_dim, hidden_dim, "tanh")
    W_oh = kaiming_normal(ks[7], hidden_dim, hidden_dim, "tanh")
    b = jnp.zeros((4 * hidden_dim, 1), jnp.float32)   # b_g,b_i,b_f,b_o (zeros)

    Wx_t = jnp.concatenate([W_gx, W_ix, W_fx, W_ox], axis=0).T   # (E, 4H)
    Wh_t = jnp.concatenate([W_gh, W_ih, W_fh, W_oh], axis=0).T   # (H, 4H)
    b_t = b.T                                                     # (1, 4H)
    return Wx_t, Wh_t, b_t


def lstm_reference(x, c0, h0, Wx_t, Wh_t, b_t):
    """Pure-JAX reference mirroring the PyTorch forward, for sanity check."""
    H = Wh_t.shape[0]
    h, c = h0.T, c0.T                            # (batch, hidden)

    def step(carry, x_t):
        h, c = carry
        gates = x_t @ Wx_t + h @ Wh_t + b_t
        g = jnp.tanh(gates[:, 0 * H:1 * H])
        i = jax.nn.sigmoid(gates[:, 1 * H:2 * H])
        f = jax.nn.sigmoid(gates[:, 2 * H:3 * H])
        o = jax.nn.sigmoid(gates[:, 3 * H:4 * H])
        c = g * i + c * f
        h = jnp.tanh(c) * o
        return (h, c), None

    (h, c), _ = jax.lax.scan(step, (h, c), jnp.transpose(x, (1, 0, 2)))
    return h.T                                   # (hidden, batch)


if __name__ == "__main__":
    batch, seq, input_dim, hidden_dim = 2, 8, 16, 32

    key = jax.random.PRNGKey(0)
    k_x, k_h, k_c, k_w = jax.random.split(key, 4)

    x = jax.random.normal(k_x, (batch, seq, input_dim), dtype=jnp.float32)
    h0 = jax.random.normal(k_h, (hidden_dim, batch), dtype=jnp.float32)
    c0 = jax.random.normal(k_c, (hidden_dim, batch), dtype=jnp.float32)
    Wx_t, Wh_t, b_t = make_params(k_w, input_dim, hidden_dim)

    h_ref = jax.block_until_ready(lstm_reference(x, c0, h0, Wx_t, Wh_t, b_t))

    # Default path: bf16 MXU inputs (native on v5e/v6e/v7x), f32 accumulation.
    h_out = lstm_cell_forward(x, c0, h0, Wx_t, Wh_t, b_t)
    h_out = jax.block_until_ready(h_out)
    assert h_out.shape == (hidden_dim, batch)
    assert jnp.allclose(h_out, h_ref, rtol=5e-2, atol=5e-2)

    # Full-f32 path (tight tolerance) to validate exact numerics.
    h_out_f32 = lstm_cell_forward(x, c0, h0, Wx_t, Wh_t, b_t,
                                  use_bf16_matmul=False)
    h_out_f32 = jax.block_until_ready(h_out_f32)
    assert jnp.allclose(h_out_f32, h_ref, rtol=1e-4, atol=1e-4)

    print("KERNEL_OK")
</pallas_src>

<mosaic_0001>
module attributes {stable_mosaic.version = 11 : i64} {
  func.func @_lstm_kernel(%arg0: i32, %arg1: i32, %arg2: memref<8x8x512xbf16, #tpu.memory_space<vmem>>, %arg3: memref<128x512xbf16, #tpu.memory_space<vmem>>, %arg4: memref<8x128xf32, #tpu.memory_space<vmem>>, %arg5: memref<8x128xf32, #tpu.memory_space<vmem>>, %arg6: memref<8x128xf32, #tpu.memory_space<vmem>>, %arg7: memref<8x128xf32, #tpu.memory_space<vmem>>) attributes {dimension_semantics = [#tpu.dimension_semantics<parallel>, #tpu.dimension_semantics<arbitrary>], iteration_bounds = array<i64: 1, 1>, scalar_prefetch = 0 : i64, scratch_operands = 1 : i64, tpu.core_type = #tpu.core_type<tc>, window_params = [{transform_indices = @transform_0, window_bounds = array<i64: 8, 8, 512>}, {pipeline_mode = #tpu.pipeline_mode<synchronous>, transform_indices = @transform_1, window_bounds = array<i64: 128, 512>}, {transform_indices = @transform_2, window_bounds = array<i64: 8, 128>}, {transform_indices = @transform_3, window_bounds = array<i64: 8, 128>}, {transform_indices = @transform_4, window_bounds = array<i64: 8, 128>}]} {
    %c0_i32 = arith.constant 0 : i32
    %0 = arith.cmpi eq, %arg1, %c0_i32 : i32
    %1 = arith.extui %0 : i1 to i32
    %c0_i32_0 = arith.constant 0 : i32
    %2 = arith.cmpi ne, %1, %c0_i32_0 : i32
    scf.if %2 {
      %c0_58 = arith.constant 0 : index
      %c0_59 = arith.constant 0 : index
      %208 = vector.load %arg4[%c0_58, %c0_59] : memref<8x128xf32, #tpu.memory_space<vmem>>, vector<8x128xf32>
      %c0_60 = arith.constant 0 : index
      %c0_61 = arith.constant 0 : index
      %209 = vector.load %arg6[%c0_60, %c0_61] : memref<8x128xf32, #tpu.memory_space<vmem>>, vector<8x128xf32>
      tpu.vector_store %arg6[%c0_60, %c0_61], %208 {strides = array<i32>} : memref<8x128xf32, #tpu.memory_space<vmem>>, vector<8x128xf32>,
      %c0_62 = arith.constant 0 : index
      %c0_63 = arith.constant 0 : index
      %210 = vector.load %arg5[%c0_62, %c0_63] : memref<8x128xf32, #tpu.memory_space<vmem>>, vector<8x128xf32>
      %c0_64 = arith.constant 0 : index
      %c0_65 = arith.constant 0 : index
      %211 = vector.load %arg7[%c0_64, %c0_65] : memref<8x128xf32, #tpu.memory_space<vmem>>, vector<8x128xf32>
      tpu.vector_store %arg7[%c0_64, %c0_65], %210 {strides = array<i32>} : memref<8x128xf32, #tpu.memory_space<vmem>>, vector<8x128xf32>,
    } else {
    }
    %c0 = arith.constant 0 : index
    %c0_1 = arith.constant 0 : index
    %3 = vector.load %arg3[%c0, %c0_1] : memref<128x512xbf16, #tpu.memory_space<vmem>>, vector<128x512xbf16>
    %c0_2 = arith.constant 0 : index
    %c0_3 = arith.constant 0 : index
    %4 = vector.load %arg6[%c0_2, %c0_3] : memref<8x128xf32, #tpu.memory_space<vmem>>, vector<8x128xf32>
    %c0_4 = arith.constant 0 : index
    %c0_5 = arith.constant 0 : index
    %5 = vector.load %arg7[%c0_4, %c0_5] : memref<8x128xf32, #tpu.memory_space<vmem>>, vector<8x128xf32>
    %c0_i32_6 = arith.constant 0 : i32
    %6 = arith.index_cast %c0_i32_6 : i32 to index
    %c0_7 = arith.constant 0 : index
    %c0_8 = arith.constant 0 : index
    %7 = vector.load %arg2[%6, %c0_7, %c0_8] : memref<8x8x512xbf16, #tpu.memory_space<vmem>>, vector<1x8x512xbf16>
    %8 = vector.shape_cast %7 : vector<1x8x512xbf16> to vector<8x512xbf16>
    %9 = arith.extf %8 : vector<8x512xbf16> to vector<8x512xf32>
    %10 = arith.truncf %4 : vector<8x128xf32> to vector<8x128xbf16>
    %cst = arith.constant dense<0.000000e+00> : vector<8x512xf32>
    %11 = tpu.matmul %10, %3, %cst {dimension_numbers = #tpu.dot_dimension_numbers<[1], [0], [0], [1], [0, 0, 1, 1], [], []>} : vector<8x128xbf16>, vector<128x512xbf16>, vector<8x512xf32> -> vector<8x512xf32>
    %12 = arith.addf %9, %11 : vector<8x512xf32>
    %13 = vector.extract_strided_slice %12 {offsets = [0, 0], sizes = [8, 128], strides = [1, 1]} : vector<8x512xf32> to vector<8x128xf32>
    %14 = math.tanh %13 : vector<8x128xf32>
    %15 = vector.extract_strided_slice %12 {offsets = [0, 128], sizes = [8, 384], strides = [1, 1]} : vector<8x512xf32> to vector<8x384xf32>
    %cst_9 = arith.constant 5.000000e-01 : f32
    %16 = vector.broadcast %cst_9 : f32 to vector<8x384xf32>
    %17 = arith.mulf %16, %15 : vector<8x384xf32>
    %18 = math.tanh %17 : vector<8x384xf32>
    %cst_10 = arith.constant 1.000000e+00 : f32
    %19 = vector.broadcast %cst_10 : f32 to vector<8x384xf32>
    %20 = arith.addf %18, %19 : vector<8x384xf32>
    %cst_11 = arith.constant 5.000000e-01 : f32
    %21 = vector.broadcast %cst_11 : f32 to vector<8x384xf32>
    %22 = arith.mulf %21, %20 : vector<8x384xf32>
    %23 = vector.extract_strided_slice %22 {offsets = [0, 0], sizes = [8, 128], strides = [1, 1]} : vector<8x384xf32> to vector<8x128xf32>
    %24 = vector.extract_strided_slice %22 {offsets = [0, 128], sizes = [8, 128], strides = [1, 1]} : vector<8x384xf32> to vector<8x128xf32>
    %25 = vector.extract_strided_slice %22 {offsets = [0, 256], sizes = [8, 128], strides = [1, 1]} : vector<8x384xf32> to vector<8x128xf32>
    %26 = arith.mulf %14, %23 : vector<8x128xf32>
    %27 = arith.mulf %5, %24 : vector<8x128xf32>
    %28 = arith.addf %26, %27 : vector<8x128xf32>
    %29 = math.tanh %28 : vector<8x128xf32>
    %30 = arith.mulf %29, %25 : vector<8x128xf32>
    %c1_i32 = arith.constant 1 : i32
    %31 = arith.index_cast %c1_i32 : i32 to index
    %c0_12 = arith.constant 0 : index
    %c0_13 = arith.constant 0 : index
    %32 = vector.load %arg2[%31, %c0_12, %c0_13] : memref<8x8x512xbf16, #tpu.memory_space<vmem>>, vector<1x8x512xbf16>
    %33 = vector.shape_cast %32 : vector<1x8x512xbf16> to vector<8x512xbf16>
    %34 = arith.extf %33 : vector<8x512xbf16> to vector<8x512xf32>
    %35 = arith.truncf %30 : vector<8x128xf32> to vector<8x128xbf16>
    %cst_14 = arith.constant dense<0.000000e+00> : vector<8x512xf32>
    %36 = tpu.matmul %35, %3, %cst_14 {dimension_numbers = #tpu.dot_dimension_numbers<[1], [0], [0], [1], [0, 0, 1, 1], [], []>} : vector<8x128xbf16>, vector<128x512xbf16>, vector<8x512xf32> -> vector<8x512xf32>
    %37 = arith.addf %34, %36 : vector<8x512xf32>
    %38 = vector.extract_strided_slice %37 {offsets = [0, 0], sizes = [8, 128], strides = [1, 1]} : vector<8x512xf32> to vector<8x128xf32>
    %39 = math.tanh %38 : vector<8x128xf32>
    %40 = vector.extract_strided_slice %37 {offsets = [0, 128], sizes = [8, 384], strides = [1, 1]} : vector<8x512xf32> to vector<8x384xf32>
    %cst_15 = arith.constant 5.000000e-01 : f32
    %41 = vector.broadcast %cst_15 : f32 to vector<8x384xf32>
    %42 = arith.mulf %41, %40 : vector<8x384xf32>
    %43 = math.tanh %42 : vector<8x384xf32>
    %cst_16 = arith.constant 1.000000e+00 : f32
    %44 = vector.broadcast %cst_16 : f32 to vector<8x384xf32>
    %45 = arith.addf %43, %44 : vector<8x384xf32>
    %cst_17 = arith.constant 5.000000e-01 : f32
    %46 = vector.broadcast %cst_17 : f32 to vector<8x384xf32>
    %47 = arith.mulf %46, %45 : vector<8x384xf32>
    %48 = vector.extract_strided_slice %47 {offsets = [0, 0], sizes = [8, 128], strides = [1, 1]} : vector<8x384xf32> to vector<8x128xf32>
    %49 = vector.extract_strided_slice %47 {offsets = [0, 128], sizes = [8, 128], strides = [1, 1]} : vector<8x384xf32> to vector<8x128xf32>
    %50 = vector.extract_strided_slice %47 {offsets = [0, 256], sizes = [8, 128], strides = [1, 1]} : vector<8x384xf32> to vector<8x128xf32>
    %51 = arith.mulf %39, %48 : vector<8x128xf32>
    %52 = arith.mulf %28, %49 : vector<8x128xf32>
    %53 = arith.addf %51, %52 : vector<8x128xf32>
    %54 = math.tanh %53 : vector<8x128xf32>
    %55 = arith.mulf %54, %50 : vector<8x128xf32>
    %c2_i32 = arith.constant 2 : i32
    %56 = arith.index_cast %c2_i32 : i32 to index
    %c0_18 = arith.constant 0 : index
    %c0_19 = arith.constant 0 : index
    %57 = vector.load %arg2[%56, %c0_18, %c0_19] : memref<8x8x512xbf16, #tpu.memory_space<vmem>>, vector<1x8x512xbf16>
    %58 = vector.shape_cast %57 : vector<1x8x512xbf16> to vector<8x512xbf16>
    %59 = arith.extf %58 : vector<8x512xbf16> to vector<8x512xf32>
    %60 = arith.truncf %55 : vector<8x128xf32> to vector<8x128xbf16>
    %cst_20 = arith.constant dense<0.000000e+00> : vector<8x512xf32>
    %61 = tpu.matmul %60, %3, %cst_20 {dimension_numbers = #tpu.dot_dimension_numbers<[1], [0], [0], [1], [0, 0, 1, 1], [], []>} : vector<8x128xbf16>, vector<128x512xbf16>, vector<8x512xf32> -> vector<8x512xf32>
    %62 = arith.addf %59, %61 : vector<8x512xf32>
    %63 = vector.extract_strided_slice %62 {offsets = [0, 0], sizes = [8, 128], strides = [1, 1]} : vector<8x512xf32> to vector<8x128xf32>
    %64 = math.tanh %63 : vector<8x128xf32>
    %65 = vector.extract_strided_slice %62 {offsets = [0, 128], sizes = [8, 384], strides = [1, 1]} : vector<8x512xf32> to vector<8x384xf32>
    %cst_21 = arith.constant 5.000000e-01 : f32
    %66 = vector.broadcast %cst_21 : f32 to vector<8x384xf32>
    %67 = arith.mulf %66, %65 : vector<8x384xf32>
    %68 = math.tanh %67 : vector<8x384xf32>
    %cst_22 = arith.constant 1.000000e+00 : f32
    %69 = vector.broadcast %cst_22 : f32 to vector<8x384xf32>
    %70 = arith.addf %68, %69 : vector<8x384xf32>
    %cst_23 = arith.constant 5.000000e-01 : f32
    %71 = vector.broadcast %cst_23 : f32 to vector<8x384xf32>
    %72 = arith.mulf %71, %70 : vector<8x384xf32>
    %73 = vector.extract_strided_slice %72 {offsets = [0, 0], sizes = [8, 128], strides = [1, 1]} : vector<8x384xf32> to vector<8x128xf32>
    %74 = vector.extract_strided_slice %72 {offsets = [0, 128], sizes = [8, 128], strides = [1, 1]} : vector<8x384xf32> to vector<8x128xf32>
    %75 = vector.extract_strided_slice %72 {offsets = [0, 256], sizes = [8, 128], strides = [1, 1]} : vector<8x384xf32> to vector<8x128xf32>
    %76 = arith.mulf %64, %73 : vector<8x128xf32>
    %77 = arith.mulf %53, %74 : vector<8x128xf32>
    %78 = arith.addf %76, %77 : vector<8x128xf32>
    %79 = math.tanh %78 : vector<8x128xf32>
    %80 = arith.mulf %79, %75 : vector<8x128xf32>
    %c3_i32 = arith.constant 3 : i32
    %81 = arith.index_cast %c3_i32 : i32 to index
    %c0_24 = arith.constant 0 : index
    %c0_25 = arith.constant 0 : index
    %82 = vector.load %arg2[%81, %c0_24, %c0_25] : memref<8x8x512xbf16, #tpu.memory_space<vmem>>, vector<1x8x512xbf16>
    %83 = vector.shape_cast %82 : vector<1x8x512xbf16> to vector<8x512xbf16>
    %84 = arith.extf %83 : vector<8x512xbf16> to vector<8x512xf32>
    %85 = arith.truncf %80 : vector<8x128xf32> to vector<8x128xbf16>
    %cst_26 = arith.constant dense<0.000000e+00> : vector<8x512xf32>
    %86 = tpu.matmul %85, %3, %cst_26 {dimension_numbers = #tpu.dot_dimension_numbers<[1], [0], [0], [1], [0, 0, 1, 1], [], []>} : vector<8x128xbf16>, vector<128x512xbf16>, vector<8x512xf32> -> vector<8x512xf32>
    %87 = arith.addf %84, %86 : vector<8x512xf32>
    %88 = vector.extract_strided_slice %87 {offsets = [0, 0], sizes = [8, 128], strides = [1, 1]} : vector<8x512xf32> to vector<8x128xf32>
    %89 = math.tanh %88 : vector<8x128xf32>
    %90 = vector.extract_strided_slice %87 {offsets = [0, 128], sizes = [8, 384], strides = [1, 1]} : vector<8x512xf32> to vector<8x384xf32>
    %cst_27 = arith.constant 5.000000e-01 : f32
    %91 = vector.broadcast %cst_27 : f32 to vector<8x384xf32>
    %92 = arith.mulf %91, %90 : vector<8x384xf32>
    %93 = math.tanh %92 : vector<8x384xf32>
    %cst_28 = arith.constant 1.000000e+00 : f32
    %94 = vector.broadcast %cst_28 : f32 to vector<8x384xf32>
    %95 = arith.addf %93, %94 : vector<8x384xf32>
    %cst_29 = arith.constant 5.000000e-01 : f32
    %96 = vector.broadcast %cst_29 : f32 to vector<8x384xf32>
    %97 = arith.mulf %96, %95 : vector<8x384xf32>
    %98 = vector.extract_strided_slice %97 {offsets = [0, 0], sizes = [8, 128], strides = [1, 1]} : vector<8x384xf32> to vector<8x128xf32>
    %99 = vector.extract_strided_slice %97 {offsets = [0, 128], sizes = [8, 128], strides = [1, 1]} : vector<8x384xf32> to vector<8x128xf32>
    %100 = vector.extract_strided_slice %97 {offsets = [0, 256], sizes = [8, 128], strides = [1, 1]} : vector<8x384xf32> to vector<8x128xf32>
    %101 = arith.mulf %89, %98 : vector<8x128xf32>
    %102 = arith.mulf %78, %99 : vector<8x128xf32>
    %103 = arith.addf %101, %102 : vector<8x128xf32>
    %104 = math.tanh %103 : vector<8x128xf32>
    %105 = arith.mulf %104, %100 : vector<8x128xf32>
    %c4_i32 = arith.constant 4 : i32
    %106 = arith.index_cast %c4_i32 : i32 to index
    %c0_30 = arith.constant 0 : index
    %c0_31 = arith.constant 0 : index
    %107 = vector.load %arg2[%106, %c0_30, %c0_31] : memref<8x8x512xbf16, #tpu.memory_space<vmem>>, vector<1x8x512xbf16>
    %108 = vector.shape_cast %107 : vector<1x8x512xbf16> to vector<8x512xbf16>
    %109 = arith.extf %108 : vector<8x512xbf16> to vector<8x512xf32>
    %110 = arith.truncf %105 : vector<8x128xf32> to vector<8x128xbf16>
    %cst_32 = arith.constant dense<0.000000e+00> : vector<8x512xf32>
    %111 = tpu.matmul %110, %3, %cst_32 {dimension_numbers = #tpu.dot_dimension_numbers<[1], [0], [0], [1], [0, 0, 1, 1], [], []>} : vector<8x128xbf16>, vector<128x512xbf16>, vector<8x512xf32> -> vector<8x512xf32>
    %112 = arith.addf %109, %111 : vector<8x512xf32>
    %113 = vector.extract_strided_slice %112 {offsets = [0, 0], sizes = [8, 128], strides = [1, 1]} : vector<8x512xf32> to vector<8x128xf32>
    %114 = math.tanh %113 : vector<8x128xf32>
    %115 = vector.extract_strided_slice %112 {offsets = [0, 128], sizes = [8, 384], strides = [1, 1]} : vector<8x512xf32> to vector<8x384xf32>
    %cst_33 = arith.constant 5.000000e-01 : f32
    %116 = vector.broadcast %cst_33 : f32 to vector<8x384xf32>
    %117 = arith.mulf %116, %115 : vector<8x384xf32>
    %118 = math.tanh %117 : vector<8x384xf32>
    %cst_34 = arith.constant 1.000000e+00 : f32
    %119 = vector.broadcast %cst_34 : f32 to vector<8x384xf32>
    %120 = arith.addf %118, %119 : vector<8x384xf32>
    %cst_35 = arith.constant 5.000000e-01 : f32
    %121 = vector.broadcast %cst_35 : f32 to vector<8x384xf32>
    %122 = arith.mulf %121, %120 : vector<8x384xf32>
    %123 = vector.extract_strided_slice %122 {offsets = [0, 0], sizes = [8, 128], strides = [1, 1]} : vector<8x384xf32> to vector<8x128xf32>
    %124 = vector.extract_strided_slice %122 {offsets = [0, 128], sizes = [8, 128], strides = [1, 1]} : vector<8x384xf32> to vector<8x128xf32>
    %125 = vector.extract_strided_slice %122 {offsets = [0, 256], sizes = [8, 128], strides = [1, 1]} : vector<8x384xf32> to vector<8x128xf32>
    %126 = arith.mulf %114, %123 : vector<8x128xf32>
    %127 = arith.mulf %103, %124 : vector<8x128xf32>
    %128 = arith.addf %126, %127 : vector<8x128xf32>
    %129 = math.tanh %128 : vector<8x128xf32>
    %130 = arith.mulf %129, %125 : vector<8x128xf32>
    %c5_i32 = arith.constant 5 : i32
    %131 = arith.index_cast %c5_i32 : i32 to index
    %c0_36 = arith.constant 0 : index
    %c0_37 = arith.constant 0 : index
    %132 = vector.load %arg2[%131, %c0_36, %c0_37] : memref<8x8x512xbf16, #tpu.memory_space<vmem>>, vector<1x8x512xbf16>
    %133 = vector.shape_cast %132 : vector<1x8x512xbf16> to vector<8x512xbf16>
    %134 = arith.extf %133 : vector<8x512xbf16> to vector<8x512xf32>
    %135 = arith.truncf %130 : vector<8x128xf32> to vector<8x128xbf16>
    %cst_38 = arith.constant dense<0.000000e+00> : vector<8x512xf32>
    %136 = tpu.matmul %135, %3, %cst_38 {dimension_numbers = #tpu.dot_dimension_numbers<[1], [0], [0], [1], [0, 0, 1, 1], [], []>} : vector<8x128xbf16>, vector<128x512xbf16>, vector<8x512xf32> -> vector<8x512xf32>
    %137 = arith.addf %134, %136 : vector<8x512xf32>
    %138 = vector.extract_strided_slice %137 {offsets = [0, 0], sizes = [8, 128], strides = [1, 1]} : vector<8x512xf32> to vector<8x128xf32>
    %139 = math.tanh %138 : vector<8x128xf32>
    %140 = vector.extract_strided_slice %137 {offsets = [0, 128], sizes = [8, 384], strides = [1, 1]} : vector<8x512xf32> to vector<8x384xf32>
    %cst_39 = arith.constant 5.000000e-01 : f32
    %141 = vector.broadcast %cst_39 : f32 to vector<8x384xf32>
    %142 = arith.mulf %141, %140 : vector<8x384xf32>
    %143 = math.tanh %142 : vector<8x384xf32>
    %cst_40 = arith.constant 1.000000e+00 : f32
    %144 = vector.broadcast %cst_40 : f32 to vector<8x384xf32>
    %145 = arith.addf %143, %144 : vector<8x384xf32>
    %cst_41 = arith.constant 5.000000e-01 : f32
    %146 = vector.broadcast %cst_41 : f32 to vector<8x384xf32>
    %147 = arith.mulf %146, %145 : vector<8x384xf32>
    %148 = vector.extract_strided_slice %147 {offsets = [0, 0], sizes = [8, 128], strides = [1, 1]} : vector<8x384xf32> to vector<8x128xf32>
    %149 = vector.extract_strided_slice %147 {offsets = [0, 128], sizes = [8, 128], strides = [1, 1]} : vector<8x384xf32> to vector<8x128xf32>
    %150 = vector.extract_strided_slice %147 {offsets = [0, 256], sizes = [8, 128], strides = [1, 1]} : vector<8x384xf32> to vector<8x128xf32>
    %151 = arith.mulf %139, %148 : vector<8x128xf32>
    %152 = arith.mulf %128, %149 : vector<8x128xf32>
    %153 = arith.addf %151, %152 : vector<8x128xf32>
    %154 = math.tanh %153 : vector<8x128xf32>
    %155 = arith.mulf %154, %150 : vector<8x128xf32>
    %c6_i32 = arith.constant 6 : i32
    %156 = arith.index_cast %c6_i32 : i32 to index
    %c0_42 = arith.constant 0 : index
    %c0_43 = arith.constant 0 : index
    %157 = vector.load %arg2[%156, %c0_42, %c0_43] : memref<8x8x512xbf16, #tpu.memory_space<vmem>>, vector<1x8x512xbf16>
    %158 = vector.shape_cast %157 : vector<1x8x512xbf16> to vector<8x512xbf16>
    %159 = arith.extf %158 : vector<8x512xbf16> to vector<8x512xf32>
    %160 = arith.truncf %155 : vector<8x128xf32> to vector<8x128xbf16>
    %cst_44 = arith.constant dense<0.000000e+00> : vector<8x512xf32>
    %161 = tpu.matmul %160, %3, %cst_44 {dimension_numbers = #tpu.dot_dimension_numbers<[1], [0], [0], [1], [0, 0, 1, 1], [], []>} : vector<8x128xbf16>, vector<128x512xbf16>, vector<8x512xf32> -> vector<8x512xf32>
    %162 = arith.addf %159, %161 : vector<8x512xf32>
    %163 = vector.extract_strided_slice %162 {offsets = [0, 0], sizes = [8, 128], strides = [1, 1]} : vector<8x512xf32> to vector<8x128xf32>
    %164 = math.tanh %163 : vector<8x128xf32>
    %165 = vector.extract_strided_slice %162 {offsets = [0, 128], sizes = [8, 384], strides = [1, 1]} : vector<8x512xf32> to vector<8x384xf32>
    %cst_45 = arith.constant 5.000000e-01 : f32
    %166 = vector.broadcast %cst_45 : f32 to vector<8x384xf32>
    %167 = arith.mulf %166, %165 : vector<8x384xf32>
    %168 = math.tanh %167 : vector<8x384xf32>
    %cst_46 = arith.constant 1.000000e+00 : f32
    %169 = vector.broadcast %cst_46 : f32 to vector<8x384xf32>
    %170 = arith.addf %168, %169 : vector<8x384xf32>
    %cst_47 = arith.constant 5.000000e-01 : f32
    %171 = vector.broadcast %cst_47 : f32 to vector<8x384xf32>
    %172 = arith.mulf %171, %170 : vector<8x384xf32>
    %173 = vector.extract_strided_slice %172 {offsets = [0, 0], sizes = [8, 128], strides = [1, 1]} : vector<8x384xf32> to vector<8x128xf32>
    %174 = vector.extract_strided_slice %172 {offsets = [0, 128], sizes = [8, 128], strides = [1, 1]} : vector<8x384xf32> to vector<8x128xf32>
    %175 = vector.extract_strided_slice %172 {offsets = [0, 256], sizes = [8, 128], strides = [1, 1]} : vector<8x384xf32> to vector<8x128xf32>
    %176 = arith.mulf %164, %173 : vector<8x128xf32>
    %177 = arith.mulf %153, %174 : vector<8x128xf32>
    %178 = arith.addf %176, %177 : vector<8x128xf32>
    %179 = math.tanh %178 : vector<8x128xf32>
    %180 = arith.mulf %179, %175 : vector<8x128xf32>
    %c7_i32 = arith.constant 7 : i32
    %181 = arith.index_cast %c7_i32 : i32 to index
    %c0_48 = arith.constant 0 : index
    %c0_49 = arith.constant 0 : index
    %182 = vector.load %arg2[%181, %c0_48, %c0_49] : memref<8x8x512xbf16, #tpu.memory_space<vmem>>, vector<1x8x512xbf16>
    %183 = vector.shape_cast %182 : vector<1x8x512xbf16> to vector<8x512xbf16>
    %184 = arith.extf %183 : vector<8x512xbf16> to vector<8x512xf32>
    %185 = arith.truncf %180 : vector<8x128xf32> to vector<8x128xbf16>
    %cst_50 = arith.constant dense<0.000000e+00> : vector<8x512xf32>
    %186 = tpu.matmul %185, %3, %cst_50 {dimension_numbers = #tpu.dot_dimension_numbers<[1], [0], [0], [1], [0, 0, 1, 1], [], []>} : vector<8x128xbf16>, vector<128x512xbf16>, vector<8x512xf32> -> vector<8x512xf32>
    %187 = arith.addf %184, %186 : vector<8x512xf32>
    %188 = vector.extract_strided_slice %187 {offsets = [0, 0], sizes = [8, 128], strides = [1, 1]} : vector<8x512xf32> to vector<8x128xf32>
    %189 = math.tanh %188 : vector<8x128xf32>
    %190 = vector.extract_strided_slice %187 {offsets = [0, 128], sizes = [8, 384], strides = [1, 1]} : vector<8x512xf32> to vector<8x384xf32>
    %cst_51 = arith.constant 5.000000e-01 : f32
    %191 = vector.broadcast %cst_51 : f32 to vector<8x384xf32>
    %192 = arith.mulf %191, %190 : vector<8x384xf32>
    %193 = math.tanh %192 : vector<8x384xf32>
    %cst_52 = arith.constant 1.000000e+00 : f32
    %194 = vector.broadcast %cst_52 : f32 to vector<8x384xf32>
    %195 = arith.addf %193, %194 : vector<8x384xf32>
    %cst_53 = arith.constant 5.000000e-01 : f32
    %196 = vector.broadcast %cst_53 : f32 to vector<8x384xf32>
    %197 = arith.mulf %196, %195 : vector<8x384xf32>
    %198 = vector.extract_strided_slice %197 {offsets = [0, 0], sizes = [8, 128], strides = [1, 1]} : vector<8x384xf32> to vector<8x128xf32>
    %199 = vector.extract_strided_slice %197 {offsets = [0, 128], sizes = [8, 128], strides = [1, 1]} : vector<8x384xf32> to vector<8x128xf32>
    %200 = vector.extract_strided_slice %197 {offsets = [0, 256], sizes = [8, 128], strides = [1, 1]} : vector<8x384xf32> to vector<8x128xf32>
    %201 = arith.mulf %189, %198 : vector<8x128xf32>
    %202 = arith.mulf %178, %199 : vector<8x128xf32>
    %203 = arith.addf %201, %202 : vector<8x128xf32>
    %204 = math.tanh %203 : vector<8x128xf32>
    %205 = arith.mulf %204, %200 : vector<8x128xf32>
    %c8_i32 = arith.constant 8 : i32
    %c0_54 = arith.constant 0 : index
    %c0_55 = arith.constant 0 : index
    %206 = vector.load %arg6[%c0_54, %c0_55] : memref<8x128xf32, #tpu.memory_space<vmem>>, vector<8x128xf32>
    tpu.vector_store %arg6[%c0_54, %c0_55], %205 {strides = array<i32>} : memref<8x128xf32, #tpu.memory_space<vmem>>, vector<8x128xf32>,
    %c0_56 = arith.constant 0 : index
    %c0_57 = arith.constant 0 : index
    %207 = vector.load %arg7[%c0_56, %c0_57] : memref<8x128xf32, #tpu.memory_space<vmem>>, vector<8x128xf32>
    tpu.vector_store %arg7[%c0_56, %c0_57], %203 {strides = array<i32>} : memref<8x128xf32, #tpu.memory_space<vmem>>, vector<8x128xf32>,
    return
  }
  func.func @transform_0(%arg0: i32, %arg1: i32) -> (i32, i32, i32) {
    %c0_i32 = arith.constant 0 : i32
    %c0_i32_0 = arith.constant 0 : i32
    return %arg1, %arg0, %c0_i32 : i32, i32, i32
  }
  func.func @transform_1(%arg0: i32, %arg1: i32) -> (i32, i32) {
    %c0_i32 = arith.constant 0 : i32
    %c0_i32_0 = arith.constant 0 : i32
    %c0_i32_1 = arith.constant 0 : i32
    return %c0_i32, %c0_i32_0 : i32, i32
  }
  func.func @transform_2(%arg0: i32, %arg1: i32) -> (i32, i32) {
    %c0_i32 = arith.constant 0 : i32
    %c0_i32_0 = arith.constant 0 : i32
    return %arg0, %c0_i32 : i32, i32
  }
  func.func @transform_3(%arg0: i32, %arg1: i32) -> (i32, i32) {
    %c0_i32 = arith.constant 0 : i32
    %c0_i32_0 = arith.constant 0 : i32
    return %arg0, %c0_i32 : i32, i32
  }
  func.func @transform_4(%arg0: i32, %arg1: i32) -> (i32, i32) {
    %c0_i32 = arith.constant 0 : i32
    %c0_i32_0 = arith.constant 0 : i32
    return %arg0, %c0_i32 : i32, i32
  }
}

</mosaic_0001>

<bundles_post_ra>
// kernel: tpu_custom_call.1
= control target key start
LH: loop header
LB: loop body
LE: loop exit
PB: predicated region body
PF: predicated region fallthrough
CT: control target
= control target key end

     0   :  { %9 = vsyncpa [#allocation4], 0  ;;  %s1884_s0 = inlined_call_operand.hbm [shape: bf16[8,8,512], index: 0, kind: input, shape index: {}]   ;;  %s1885_s1 = inlined_call_operand.hbm [shape: bf16[128,512], index: 1, kind: input, shape index: {}]   ;;  %s1886_s2 = inlined_call_operand.hbm [shape: f32[8,128], index: 2, kind: input, shape index: {}]   ;;  %s1887_s3 = inlined_call_operand.vmem [shape: f32[8,128], index: 3, kind: input, shape index: {}]   ;;  %s1888_s4 = inlined_call_operand.hbm [shape: f32[8,128], index: 4, kind: output, shape index: {}]  }
   0x1   :  { %10 = vsyncpa [#allocation7], 0 }
   0x2   :  { %11 = vsyncpa [#allocation5], 0  ;;  %s1464_s15 = smov [#allocation6]   ;;  %s1465_s17 = smov [#allocation3]  }
   0x3   :  { %s29_s16 = sshll.u32 %s1464_s15, 4  ;;  %s17_s18 = sshll.u32 %s1465_s17, 4  ;;  %s30_s16 = int_to_ptr.vmem [resolvable:$true] %s29_s16  ;;  %s1496_s18 = int_to_ptr.vmem [resolvable:$true] %s17_s18 }
   0x4   :  { %s1370_s21 = scalar_lea.hbm %s1885_s1, 4096 }
   0x5   :  { %p1371_p0 = scmp.ne.s32.totalorder %s1885_s1, %s1370_s21  ;;  %p1374_p1 = scmp.lt.u32.totalorder %s1370_s21, %s1885_s1 }
   0x7   :  { %p1376_p2 = pnand %p1374_p1, %p1371_p0 }
   0x9   :  { %1379 = shalt.err (!%p1376_p2)
}
   0xa   :  { %s1380_s26 = scalar_lea.vmem %s30_s16, 4096  ;;  %p1385_p4 = scmp.lt.s32.totalorder %s30_s16, %s30_s16 }
   0xb   :  { %p1381_p3 = scmp.ne.s32.totalorder %s30_s16, %s1380_s26  ;;  %p1386_p5 = scmp.lt.s32.totalorder %s1380_s26, %s1380_s26 }
   0xd   :  { %p1387_p6 = por %p1386_p5, %p1385_p4 }
   0xf   :  { %p1388_p7 = pnand %p1387_p6, %p1381_p3 }
  0x11   :  { %1391 = shalt.err (!%p1388_p7)
}
  0x12   :  { %s1466_s27 = smov 256   ;;  %s1467_s28 = smov 16  }
  0x13   :  { %35 = dma.hbm_to_vmem [thread:$0]  %s1885_s1, 4096, %s30_s16, [#allocation7], %s1466_s27, %s1466_s27, %s1467_s28  }
  0x14   :  { %s1392_s7 = scalar_lea.hbm %s1884_s0, 2048 }
  0x15   :  { %p1393_p8 = scmp.ne.s32.totalorder %s1884_s0, %s1392_s7  ;;  %p1396_p9 = scmp.lt.u32.totalorder %s1392_s7, %s1884_s0 }
  0x17   :  { %p1398_p10 = pnand %p1396_p9, %p1393_p8 }
  0x19   :  { %1401 = shalt.err (!%p1398_p10)
}
  0x1a   :  { %s1402_s12 = scalar_lea.vmem %s1496_s18, 2048  ;;  %p1407_p12 = scmp.lt.s32.totalorder %s1496_s18, %s1496_s18 }
  0x1b   :  { %p1403_p11 = scmp.ne.s32.totalorder %s1496_s18, %s1402_s12  ;;  %p1408_p13 = scmp.lt.s32.totalorder %s1402_s12, %s1402_s12 }
  0x1d   :  { %p1409_p0 = por %p1408_p13, %p1407_p12 }
  0x1f   :  { %p1410_p1 = pnand %p1409_p0, %p1403_p11 }
  0x21   :  { %1413 = shalt.err (!%p1410_p1)
}
  0x22   :  { %23 = dma.hbm_to_vmem [thread:$0]  %s1884_s0, 2048, %s1496_s18, [#allocation4], %s1466_s27, %s1466_s27, %s1467_s28  }
  0x23   :  { %s1468_s14 = smov [#allocation8]   ;;  %s1414_s19 = scalar_lea.hbm %s1886_s2, 128 }
  0x24   :  { %s42_s15 = sshll.u32 %s1468_s14, 4  ;;  %p1415_p2 = scmp.ne.s32.totalorder %s1886_s2, %s1414_s19  ;;  %s43_s15 = int_to_ptr.vmem [resolvable:$true] %s42_s15 }
  0x25   :  { %p1418_p3 = scmp.lt.u32.totalorder %s1414_s19, %s1886_s2 }
  0x27   :  { %p1420_p4 = pnand %p1418_p3, %p1415_p2 }
  0x29   :  { %1423 = shalt.err (!%p1420_p4)
}
  0x2a   :  { %s1424_s24 = scalar_lea.vmem %s43_s15, 128  ;;  %p1429_p6 = scmp.lt.s32.totalorder %s43_s15, %s43_s15 }
  0x2b   :  { %p1425_p5 = scmp.ne.s32.totalorder %s43_s15, %s1424_s24  ;;  %p1430_p7 = scmp.lt.s32.totalorder %s1424_s24, %s1424_s24 }
  0x2d   :  { %p1431_p8 = por %p1430_p7, %p1429_p6 }
  0x2f   :  { %p1432_p9 = pnand %p1431_p8, %p1425_p5 }
  0x31   :  { %1435 = shalt.err (!%p1432_p9)
}
  0x32   :  { %45 = dma.hbm_to_vmem [thread:$0]  %s1886_s2, 128, %s43_s15, [#allocation7]  }
  0x33   :  { %1458 = dma.done.wait [#allocation4], 2048  }
  0x34   :  { %1459 = vsyncadd [#allocation4], 4294965248 }
  0x35   :  { %1460 = dma.done.wait [#allocation7], 4224  }
  0x36   :  { %1461 = vsyncadd [#allocation7], 4294963072  ;;  %v1469_v0 = vmov 0   ;;  %v1541_v1 = vld [vmem:[#allocation6 + $0x4] ss:$16 sps:$4 sm:$0xff]   ;;  %v101_v35 = vld [vmem:[#allocation3 + $0x8] sm:$0xff] }
  0x37   :  { %299 = vmatprep.mubr.bf16.mxu0 %v1469_v0  ;;  %340 = vmatprep.mubr.bf16.mxu1 %v1469_v0  ;;  %v1543_v2 = vld [vmem:[#allocation6 + $0xc] ss:$16 sps:$4 sm:$0xff]   ;;  %v1546_v3 = vld [vmem:[#allocation6] ss:$16 sps:$4 sm:$0xff]   ;;  %v1548_v4 = vld [vmem:[#allocation6 + $0x8] ss:$16 sps:$4 sm:$0xff]   ;;  %v104_v37 = vunpack.c.l.bf16 %v101_v35  ;;  %v105_v52 = vunpack.c.h.bf16 %v101_v35 }
  0x38   :  { %267 = vmatprep.subr.bf16.mxu0 %v1541_v1  ;;  %308 = vmatprep.subr.bf16.mxu1 %v1543_v2  ;;  %v1551_v5 = vld [vmem:[#allocation6 + $0x24] ss:$16 sps:$4 sm:$0xff]   ;;  %v1555_v6 = vld [vmem:[#allocation6 + $0x2c] ss:$16 sps:$4 sm:$0xff]   ;;  %v1557_v7 = vld [vmem:[#allocation6 + $0x20] ss:$16 sps:$4 sm:$0xff]  }
  0x39   :  { %268 = vmatpush1.bf16.msra.mxu0 %v1546_v3  ;;  %309 = vmatpush1.bf16.msra.mxu1 %v1548_v4  ;;  %v1560_v8 = vld [vmem:[#allocation6 + $0x28] ss:$16 sps:$4 sm:$0xff]   ;;  %v1563_v9 = vld [vmem:[#allocation6 + $0x44] ss:$16 sps:$4 sm:$0xff]   ;;  %v1565_v10 = vld [vmem:[#allocation6 + $0x4c] ss:$16 sps:$4 sm:$0xff]  }
  0x3a   :  { %269 = vmatprep.subr.bf16.mxu0 %v1551_v5  ;;  %310 = vmatprep.subr.bf16.mxu1 %v1555_v6  ;;  %v1567_v11 = vld [vmem:[#allocation6 + $0x40] ss:$16 sps:$4 sm:$0xff]   ;;  %v1569_v12 = vld [vmem:[#allocation6 + $0x48] ss:$16 sps:$4 sm:$0xff]   ;;  %v1573_v13 = vld [vmem:[#allocation6 + $0x64] ss:$16 sps:$4 sm:$0xff]  }
  0x3b   :  { %v1577_v14 = vld [vmem:[#allocation6 + $0x6c] ss:$16 sps:$4 sm:$0xff]   ;;  %v1579_v15 = vld [vmem:[#allocation6 + $0x60] ss:$16 sps:$4 sm:$0xff]   ;;  %v1583_v16 = vld [vmem:[#allocation6 + $0x68] ss:$16 sps:$4 sm:$0xff]  }
  0x3c   :  { %v1585_v17 = vld [vmem:[#allocation6 + $0x84] ss:$16 sps:$4 sm:$0xff]   ;;  %v1589_v18 = vld [vmem:[#allocation6 + $0x8c] ss:$16 sps:$4 sm:$0xff]   ;;  %v1591_v19 = vld [vmem:[#allocation6 + $0x80] ss:$16 sps:$4 sm:$0xff]  }
  0x3d   :  { %270 = vmatpush1.bf16.msra.mxu0 %v1557_v7  ;;  %311 = vmatpush1.bf16.msra.mxu1 %v1560_v8  ;;  %v1593_v20 = vld [vmem:[#allocation6 + $0x88] ss:$16 sps:$4 sm:$0xff]   ;;  %v1597_v21 = vld [vmem:[#allocation6 + $0xa4] ss:$16 sps:$4 sm:$0xff]   ;;  %v1601_v22 = vld [vmem:[#allocation6 + $0xac] ss:$16 sps:$4 sm:$0xff]  }
  0x3e   :  { %271 = vmatprep.subr.bf16.mxu0 %v1563_v9  ;;  %312 = vmatprep.subr.bf16.mxu1 %v1565_v10  ;;  %v1605_v23 = vld [vmem:[#allocation6 + $0xa0] ss:$16 sps:$4 sm:$0xff]   ;;  %v1607_v24 = vld [vmem:[#allocation6 + $0xa8] ss:$16 sps:$4 sm:$0xff]   ;;  %v1611_v25 = vld [vmem:[#allocation6 + $0xc4] ss:$16 sps:$4 sm:$0xff]  }
  0x3f   :  { %v1613_v26 = vld [vmem:[#allocation6 + $0xcc] ss:$16 sps:$4 sm:$0xff]   ;;  %v1617_v27 = vld [vmem:[#allocation6 + $0xc0] ss:$16 sps:$4 sm:$0xff]   ;;  %v1619_v28 = vld [vmem:[#allocation6 + $0xc8] ss:$16 sps:$4 sm:$0xff]  }
  0x40   :  { %v1623_v29 = vld [vmem:[#allocation6 + $0xe4] ss:$16 sps:$4 sm:$0xff]   ;;  %v1625_v30 = vld [vmem:[#allocation6 + $0xec] ss:$16 sps:$4 sm:$0xff]   ;;  %v1629_v31 = vld [vmem:[#allocation6 + $0xe0] ss:$16 sps:$4 sm:$0xff]  }
  0x41   :  { %272 = vmatpush1.bf16.msra.mxu0 %v1567_v11  ;;  %313 = vmatpush1.bf16.msra.mxu1 %v1569_v12  ;;  %v1631_v32 = vld [vmem:[#allocation6 + $0xe8] ss:$16 sps:$4 sm:$0xff]   ;;  %v62_v33 = vld [vmem:[#allocation8] sm:$0xff] }
  0x42   :  { %273 = vmatprep.subr.bf16.mxu0 %v1573_v13  ;;  %314 = vmatprep.subr.bf16.mxu1 %v1577_v14  ;;  %v106_v34 = vpack.c.bf16 %v62_v33, %v62_v33  ;;  %v100_v36 = vld [vmem:[#allocation3] sm:$0xff] }
  0x43   :  { %v103_v38 = vunpack.c.h.bf16 %v100_v36  ;;  %v102_v44 = vunpack.c.l.bf16 %v100_v36  ;;  %v64_v59 = vld [vmem:[%s1887_s3] sm:$0xff]  ;;  %s1470_s3 = smov [#allocation9]  }
  0x44   :  { %s1163_s26 = sshll.u32 %s1470_s3, 4  ;;  %s1164_s26 = int_to_ptr.vmem [resolvable:$true] %s1163_s26 }
  0x45   :  { %274 = vmatpush1.bf16.msra.mxu0 %v1579_v15  ;;  %315 = vmatpush1.bf16.msra.mxu1 %v1583_v16  ;;  %s1436_s27 = scalar_lea.vmem %s1164_s26, 128  ;;  %p1441_p11 = scmp.lt.s32.totalorder %s1164_s26, %s1164_s26 }
  0x46   :  { %275 = vmatprep.subr.bf16.mxu0 %v1585_v17  ;;  %316 = vmatprep.subr.bf16.mxu1 %v1589_v18  ;;  %p1437_p10 = scmp.ne.s32.totalorder %s1164_s26, %s1436_s27  ;;  %p1442_p12 = scmp.lt.s32.totalorder %s1436_s27, %s1436_s27 }
  0x48   :  { %p1443_p13 = por %p1442_p12, %p1441_p11 }
  0x49   :  { %276 = vmatpush1.bf16.msra.mxu0 %v1591_v19  ;;  %317 = vmatpush1.bf16.msra.mxu1 %v1593_v20 }
  0x4a   :  { %277 = vmatprep.subr.bf16.mxu0 %v1597_v21  ;;  %318 = vmatprep.subr.bf16.mxu1 %v1601_v22  ;;  %p1444_p0 = pnand %p1443_p13, %p1437_p10 }
  0x4d   :  { %278 = vmatpush1.bf16.msra.mxu0 %v1605_v23  ;;  %319 = vmatpush1.bf16.msra.mxu1 %v1607_v24 }
  0x4e   :  { %279 = vmatprep.subr.bf16.mxu0 %v1611_v25  ;;  %320 = vmatprep.subr.bf16.mxu1 %v1613_v26 }
  0x51   :  { %280 = vmatpush1.bf16.msra.mxu0 %v1617_v27  ;;  %321 = vmatpush1.bf16.msra.mxu1 %v1619_v28 }
  0x52   :  { %281 = vmatprep.subr.bf16.mxu0 %v1623_v29  ;;  %322 = vmatprep.subr.bf16.mxu1 %v1625_v30 }
  0x55   :  { %282 = vmatpush1.bf16.msra.mxu0 %v1629_v31  ;;  %323 = vmatpush1.bf16.msra.mxu1 %v1631_v32 }
  0x56   :  { %379 = vmatprep.subr.bf16.mxu0 %v1541_v1  ;;  %420 = vmatprep.subr.bf16.mxu1 %v1543_v2 }
  0x58   :  { %300 = vmatmul.mubr.bf16.vlgmr.msra.gmra.mrb[0].mxu0 %v106_v34  ;;  %341 = vmatmul.mubr.bf16.vlgmr.msra.gmra.mrb[0].mxu1 %v106_v34 }
  0x59   :  { %380 = vmatpush1.bf16.msra.mxu0 %v1546_v3  ;;  %421 = vmatpush1.bf16.msra.mxu1 %v1548_v4 }
  0x5a   :  { %381 = vmatprep.subr.bf16.mxu0 %v1551_v5  ;;  %422 = vmatprep.subr.bf16.mxu1 %v1555_v6 }
  0x5b   :  { %411 = vmatprep.mubr.bf16.mxu0 %v1469_v0  ;;  %452 = vmatprep.mubr.bf16.mxu1 %v1469_v0 }
  0x5d   :  { %382 = vmatpush1.bf16.msra.mxu0 %v1557_v7  ;;  %423 = vmatpush1.bf16.msra.mxu1 %v1560_v8 }
  0x5e   :  { %383 = vmatprep.subr.bf16.mxu0 %v1563_v9  ;;  %424 = vmatprep.subr.bf16.mxu1 %v1565_v10 }
  0x61   :  { %384 = vmatpush1.bf16.msra.mxu0 %v1567_v11  ;;  %425 = vmatpush1.bf16.msra.mxu1 %v1569_v12 }
  0x62   :  { %385 = vmatprep.subr.bf16.mxu0 %v1573_v13  ;;  %426 = vmatprep.subr.bf16.mxu1 %v1577_v14 }
  0x65   :  { %386 = vmatpush1.bf16.msra.mxu0 %v1579_v15  ;;  %427 = vmatpush1.bf16.msra.mxu1 %v1583_v16 }
  0x66   :  { %387 = vmatprep.subr.bf16.mxu0 %v1585_v17  ;;  %428 = vmatprep.subr.bf16.mxu1 %v1589_v18 }
  0x69   :  { %388 = vmatpush1.bf16.msra.mxu0 %v1591_v19  ;;  %429 = vmatpush1.bf16.msra.mxu1 %v1593_v20 }
  0x6a   :  { %389 = vmatprep.subr.bf16.mxu0 %v1597_v21  ;;  %430 = vmatprep.subr.bf16.mxu1 %v1601_v22 }
  0x6d   :  { %390 = vmatpush1.bf16.msra.mxu0 %v1605_v23  ;;  %431 = vmatpush1.bf16.msra.mxu1 %v1607_v24 }
  0x6e   :  { %391 = vmatprep.subr.bf16.mxu0 %v1611_v25  ;;  %432 = vmatprep.subr.bf16.mxu1 %v1613_v26 }
  0x71   :  { %392 = vmatpush1.bf16.msra.mxu0 %v1617_v27  ;;  %433 = vmatpush1.bf16.msra.mxu1 %v1619_v28 }
  0x72   :  { %393 = vmatprep.subr.bf16.mxu0 %v1623_v29  ;;  %434 = vmatprep.subr.bf16.mxu1 %v1625_v30 }
  0x75   :  { %394 = vmatpush1.bf16.msra.mxu0 %v1629_v31  ;;  %435 = vmatpush1.bf16.msra.mxu1 %v1631_v32 }
  0x76   :  { %491 = vmatprep.subr.bf16.mxu0 %v1541_v1  ;;  %532 = vmatprep.subr.bf16.mxu1 %v1543_v2 }
 0x12b   :  { %v301_v39 = vpop.f32.mrb[0].mxu0  ;;  %v342_v40 = vpop.f32.mrb[0].mxu1 }
 0x12c   :  { %v351_v41 = vadd.f32 %v342_v40, %v104_v37  ;;  %v303_v42 = vpop.f32.mrb[1].mxu0  ;;  %v344_v43 = vpop.f32.mrb[1].mxu1  ;;  %v349_v53 = vadd.f32 %v301_v39, %v102_v44 }
 0x12d   :  { %v350_v45 = vadd.f32 %v303_v42, %v103_v38  ;;  %v305_v46 = vpop.f32.mrb[2].mxu0  ;;  %v346_v47 = vpop.f32.mrb[2].mxu1  ;;  %v352_v54 = vadd.f32 %v344_v43, %v105_v52  ;;  %v373_v42 = vld [vmem:[#allocation3 + $0x18] sm:$0xff]  ;;  %v372_v43 = vld [vmem:[#allocation3 + $0x10] sm:$0xff] }
 0x12e   :  { %v355_v48 = vmul.f32 0.5, %v351_v41  ;;  %v306_v49 = vpop.f32.mrb[3].mxu0  ;;  %v347_v50 = vpop.f32.mrb[3].mxu1  ;;  %v376_v44 = vunpack.c.l.bf16 %v373_v42 }
 0x12f   :  { %v354_v51 = vmul.f32 0.5, %v350_v45  ;;  %v356_v55 = vmul.f32 0.5, %v352_v54  ;;  %v375_v45 = vunpack.c.h.bf16 %v372_v43 }
 0x130   :  { %1260 = vtanh.f32 %v355_v48 }
 0x131   :  { %1262 = vtanh.f32 %v354_v51  ;;  %v374_v51 = vunpack.c.l.bf16 %v372_v43 }
 0x132   :  { %1264 = vtanh.f32 %v349_v53 }
 0x133   :  { %1266 = vtanh.f32 %v356_v55 }
 0x13a   :  { %v1261_v56 = vpop.eup %1260 }
 0x13b   :  { %v1263_v57 = vpop.eup %1262  ;;  %v361_v58 = vadd.f32 1.0, %v1261_v56 }
 0x13c   :  { %v360_v60 = vadd.f32 1.0, %v1263_v57  ;;  %v1265_v63 = vpop.eup %1264 }
 0x13d   :  { %v364_v61 = vmul.f32 0.5, %v361_v58  ;;  %v1267_v36 = vpop.eup %1266 }
 0x13e   :  { %v363_v62 = vmul.f32 0.5, %v360_v60  ;;  %v362_v37 = vadd.f32 1.0, %v1267_v36 }
 0x13f   :  { %v367_v33 = vmul.f32 %v364_v61, %v64_v59  ;;  %v377_v59 = vunpack.c.h.bf16 %v373_v42 }
 0x140   :  { %v366_v34 = vmul.f32 %v1265_v63, %v363_v62  ;;  %v365_v38 = vmul.f32 0.5, %v362_v37 }
 0x142   :  { %v1676_v35 = vadd.f32 %v367_v33, %v366_v34 }
 0x144   :  { %1268 = vtanh.f32 %v1676_v35 }
 0x14e   :  { %v1269_v39 = vpop.eup %1268 }
 0x14f   :  { %v370_v40 = vmul.f32 %v1269_v39, %v365_v38 }
 0x151   :  { %v378_v41 = vpack.c.bf16 %v370_v40, %v370_v40 }
 0x153   :  { %412 = vmatmul.mubr.bf16.vlgmr.msra.gmra.mrb[4].mxu0 %v378_v41  ;;  %453 = vmatmul.mubr.bf16.vlgmr.msra.gmra.mrb[4].mxu1 %v378_v41 }
 0x154   :  { %492 = vmatpush1.bf16.msra.mxu0 %v1546_v3  ;;  %533 = vmatpush1.bf16.msra.mxu1 %v1548_v4 }
 0x155   :  { %493 = vmatprep.subr.bf16.mxu0 %v1551_v5  ;;  %534 = vmatprep.subr.bf16.mxu1 %v1555_v6 }
 0x156   :  { %523 = vmatprep.mubr.bf16.mxu0 %v1469_v0  ;;  %564 = vmatprep.mubr.bf16.mxu1 %v1469_v0 }
 0x158   :  { %494 = vmatpush1.bf16.msra.mxu0 %v1557_v7  ;;  %535 = vmatpush1.bf16.msra.mxu1 %v1560_v8 }
 0x159   :  { %495 = vmatprep.subr.bf16.mxu0 %v1563_v9  ;;  %536 = vmatprep.subr.bf16.mxu1 %v1565_v10 }
 0x15c   :  { %496 = vmatpush1.bf16.msra.mxu0 %v1567_v11  ;;  %537 = vmatpush1.bf16.msra.mxu1 %v1569_v12 }
 0x15d   :  { %497 = vmatprep.subr.bf16.mxu0 %v1573_v13  ;;  %538 = vmatprep.subr.bf16.mxu1 %v1577_v14 }
 0x160   :  { %498 = vmatpush1.bf16.msra.mxu0 %v1579_v15  ;;  %539 = vmatpush1.bf16.msra.mxu1 %v1583_v16 }
 0x161   :  { %499 = vmatprep.subr.bf16.mxu0 %v1585_v17  ;;  %540 = vmatprep.subr.bf16.mxu1 %v1589_v18 }
 0x164   :  { %500 = vmatpush1.bf16.msra.mxu0 %v1591_v19  ;;  %541 = vmatpush1.bf16.msra.mxu1 %v1593_v20 }
 0x165   :  { %501 = vmatprep.subr.bf16.mxu0 %v1597_v21  ;;  %542 = vmatprep.subr.bf16.mxu1 %v1601_v22 }
 0x168   :  { %502 = vmatpush1.bf16.msra.mxu0 %v1605_v23  ;;  %543 = vmatpush1.bf16.msra.mxu1 %v1607_v24 }
 0x169   :  { %503 = vmatprep.subr.bf16.mxu0 %v1611_v25  ;;  %544 = vmatprep.subr.bf16.mxu1 %v1613_v26 }
 0x16c   :  { %504 = vmatpush1.bf16.msra.mxu0 %v1617_v27  ;;  %545 = vmatpush1.bf16.msra.mxu1 %v1619_v28 }
 0x16d   :  { %505 = vmatprep.subr.bf16.mxu0 %v1623_v29  ;;  %546 = vmatprep.subr.bf16.mxu1 %v1625_v30 }
 0x170   :  { %506 = vmatpush1.bf16.msra.mxu0 %v1629_v31  ;;  %547 = vmatpush1.bf16.msra.mxu1 %v1631_v32 }
 0x171   :  { %603 = vmatprep.subr.bf16.mxu0 %v1541_v1  ;;  %644 = vmatprep.subr.bf16.mxu1 %v1543_v2 }
 0x226   :  { %v413_v46 = vpop.f32.mrb[4].mxu0  ;;  %v454_v47 = vpop.f32.mrb[4].mxu1 }
 0x227   :  { %v463_v48 = vadd.f32 %v454_v47, %v376_v44  ;;  %v415_v49 = vpop.f32.mrb[5].mxu0  ;;  %v456_v50 = vpop.f32.mrb[5].mxu1  ;;  %v461_v60 = vadd.f32 %v413_v46, %v374_v51 }
 0x228   :  { %v462_v52 = vadd.f32 %v415_v49, %v375_v45  ;;  %v417_v53 = vpop.f32.mrb[6].mxu0  ;;  %v458_v54 = vpop.f32.mrb[6].mxu1  ;;  %v464_v61 = vadd.f32 %v456_v50, %v377_v59  ;;  %v484_v49 = vld [vmem:[#allocation3 + $0x20] sm:$0xff] }
 0x229   :  { %v467_v55 = vmul.f32 0.5, %v463_v48  ;;  %v418_v56 = vpop.f32.mrb[7].mxu0  ;;  %v459_v57 = vpop.f32.mrb[7].mxu1  ;;  %v487_v51 = vunpack.c.h.bf16 %v484_v49 }
 0x22a   :  { %v466_v58 = vmul.f32 0.5, %v462_v52  ;;  %v468_v62 = vmul.f32 0.5, %v464_v61  ;;  %v486_v57 = vunpack.c.l.bf16 %v484_v49 }
 0x22b   :  { %1270 = vtanh.f32 %v467_v55 }
 0x22c   :  { %1272 = vtanh.f32 %v466_v58 }
 0x22d   :  { %1274 = vtanh.f32 %v461_v60 }
 0x22e   :  { %1276 = vtanh.f32 %v468_v62 }
 0x235   :  { %v1271_v63 = vpop.eup %1270 }
 0x236   :  { %v1273_v33 = vpop.eup %1272  ;;  %v473_v34 = vadd.f32 1.0, %v1271_v63 }
 0x237   :  { %v472_v36 = vadd.f32 1.0, %v1273_v33  ;;  %v1275_v39 = vpop.eup %1274 }
 0x238   :  { %v476_v37 = vmul.f32 0.5, %v473_v34  ;;  %v1277_v42 = vpop.eup %1276 }
 0x239   :  { %v475_v38 = vmul.f32 0.5, %v472_v36  ;;  %v474_v44 = vadd.f32 1.0, %v1277_v42 }
 0x23a   :  { %v479_v40 = vmul.f32 %v476_v37, %v1676_v35  ;;  %v485_v35 = vld [vmem:[#allocation3 + $0x28] sm:$0xff] }
 0x23b   :  { %v478_v41 = vmul.f32 %v1275_v39, %v475_v38  ;;  %v477_v45 = vmul.f32 0.5, %v474_v44  ;;  %v488_v50 = vunpack.c.l.bf16 %v485_v35  ;;  %v489_v34 = vunpack.c.h.bf16 %v485_v35 }
 0x23d   :  { %v1714_v43 = vadd.f32 %v479_v40, %v478_v41 }
 0x23f   :  { %1278 = vtanh.f32 %v1714_v43 }
 0x249   :  { %v1279_v46 = vpop.eup %1278 }
 0x24a   :  { %v482_v47 = vmul.f32 %v1279_v46, %v477_v45 }
 0x24c   :  { %v490_v48 = vpack.c.bf16 %v482_v47, %v482_v47 }
 0x24e   :  { %524 = vmatmul.mubr.bf16.vlgmr.msra.gmra.mrb[8].mxu0 %v490_v48  ;;  %565 = vmatmul.mubr.bf16.vlgmr.msra.gmra.mrb[8].mxu1 %v490_v48 }
 0x24f   :  { %604 = vmatpush1.bf16.msra.mxu0 %v1546_v3  ;;  %645 = vmatpush1.bf16.msra.mxu1 %v1548_v4 }
 0x250   :  { %605 = vmatprep.subr.bf16.mxu0 %v1551_v5  ;;  %646 = vmatprep.subr.bf16.mxu1 %v1555_v6 }
 0x251   :  { %635 = vmatprep.mubr.bf16.mxu0 %v1469_v0  ;;  %676 = vmatprep.mubr.bf16.mxu1 %v1469_v0 }
 0x253   :  { %606 = vmatpush1.bf16.msra.mxu0 %v1557_v7  ;;  %647 = vmatpush1.bf16.msra.mxu1 %v1560_v8 }
 0x254   :  { %607 = vmatprep.subr.bf16.mxu0 %v1563_v9  ;;  %648 = vmatprep.subr.bf16.mxu1 %v1565_v10 }
 0x257   :  { %608 = vmatpush1.bf16.msra.mxu0 %v1567_v11  ;;  %649 = vmatpush1.bf16.msra.mxu1 %v1569_v12 }
 0x258   :  { %609 = vmatprep.subr.bf16.mxu0 %v1573_v13  ;;  %650 = vmatprep.subr.bf16.mxu1 %v1577_v14 }
 0x25b   :  { %610 = vmatpush1.bf16.msra.mxu0 %v1579_v15  ;;  %651 = vmatpush1.bf16.msra.mxu1 %v1583_v16 }
 0x25c   :  { %611 = vmatprep.subr.bf16.mxu0 %v1585_v17  ;;  %652 = vmatprep.subr.bf16.mxu1 %v1589_v18 }
 0x25f   :  { %612 = vmatpush1.bf16.msra.mxu0 %v1591_v19  ;;  %653 = vmatpush1.bf16.msra.mxu1 %v1593_v20 }
 0x260   :  { %613 = vmatprep.subr.bf16.mxu0 %v1597_v21  ;;  %654 = vmatprep.subr.bf16.mxu1 %v1601_v22 }
 0x263   :  { %614 = vmatpush1.bf16.msra.mxu0 %v1605_v23  ;;  %655 = vmatpush1.bf16.msra.mxu1 %v1607_v24 }
 0x264   :  { %615 = vmatprep.subr.bf16.mxu0 %v1611_v25  ;;  %656 = vmatprep.subr.bf16.mxu1 %v1613_v26 }
 0x267   :  { %616 = vmatpush1.bf16.msra.mxu0 %v1617_v27  ;;  %657 = vmatpush1.bf16.msra.mxu1 %v1619_v28 }
 0x268   :  { %617 = vmatprep.subr.bf16.mxu0 %v1623_v29  ;;  %658 = vmatprep.subr.bf16.mxu1 %v1625_v30 }
 0x26b   :  { %618 = vmatpush1.bf16.msra.mxu0 %v1629_v31  ;;  %659 = vmatpush1.bf16.msra.mxu1 %v1631_v32 }
 0x26c   :  { %715 = vmatprep.subr.bf16.mxu0 %v1541_v1  ;;  %756 = vmatprep.subr.bf16.mxu1 %v1543_v2 }
 0x321   :  { %v525_v52 = vpop.f32.mrb[8].mxu0  ;;  %v566_v53 = vpop.f32.mrb[8].mxu1 }
 0x322   :  { %v575_v54 = vadd.f32 %v566_v53, %v488_v50  ;;  %v527_v55 = vpop.f32.mrb[9].mxu0  ;;  %v568_v56 = vpop.f32.mrb[9].mxu1  ;;  %v573_v36 = vadd.f32 %v525_v52, %v486_v57 }
 0x323   :  { %v574_v58 = vadd.f32 %v527_v55, %v487_v51  ;;  %v529_v59 = vpop.f32.mrb[10].mxu0  ;;  %v570_v60 = vpop.f32.mrb[10].mxu1  ;;  %v576_v37 = vadd.f32 %v568_v56, %v489_v34  ;;  %v596_v55 = vld [vmem:[#allocation3 + $0x30] sm:$0xff] }
 0x324   :  { %v579_v61 = vmul.f32 0.5, %v575_v54  ;;  %v530_v62 = vpop.f32.mrb[11].mxu0  ;;  %v571_v63 = vpop.f32.mrb[11].mxu1  ;;  %v599_v57 = vunpack.c.h.bf16 %v596_v55 }
 0x325   :  { %v578_v33 = vmul.f32 0.5, %v574_v58  ;;  %v580_v38 = vmul.f32 0.5, %v576_v37  ;;  %v598_v63 = vunpack.c.l.bf16 %v596_v55 }
 0x326   :  { %1280 = vtanh.f32 %v579_v61 }
 0x327   :  { %1282 = vtanh.f32 %v578_v33 }
 0x328   :  { %1284 = vtanh.f32 %v573_v36 }
 0x329   :  { %1286 = vtanh.f32 %v580_v38 }
 0x330   :  { %v1281_v39 = vpop.eup %1280 }
 0x331   :  { %v1283_v40 = vpop.eup %1282  ;;  %v585_v41 = vadd.f32 1.0, %v1281_v39 }
 0x332   :  { %v584_v42 = vadd.f32 1.0, %v1283_v40  ;;  %v1285_v46 = vpop.eup %1284 }
 0x333   :  { %v588_v44 = vmul.f32 0.5, %v585_v41  ;;  %v1287_v35 = vpop.eup %1286 }
 0x334   :  { %v587_v45 = vmul.f32 0.5, %v584_v42  ;;  %v586_v50 = vadd.f32 1.0, %v1287_v35 }
 0x335   :  { %v591_v47 = vmul.f32 %v588_v44, %v1714_v43  ;;  %v597_v43 = vld [vmem:[#allocation3 + $0x38] sm:$0xff] }
 0x336   :  { %v590_v48 = vmul.f32 %v1285_v46, %v587_v45  ;;  %v589_v51 = vmul.f32 0.5, %v586_v50  ;;  %v600_v56 = vunpack.c.l.bf16 %v597_v43  ;;  %v601_v41 = vunpack.c.h.bf16 %v597_v43 }
 0x338   :  { %v1752_v49 = vadd.f32 %v591_v47, %v590_v48 }
 0x33a   :  { %1288 = vtanh.f32 %v1752_v49 }
 0x344   :  { %v1289_v52 = vpop.eup %1288 }
 0x345   :  { %v594_v53 = vmul.f32 %v1289_v52, %v589_v51 }
 0x347   :  { %v602_v54 = vpack.c.bf16 %v594_v53, %v594_v53 }
 0x349   :  { %636 = vmatmul.mubr.bf16.vlgmr.msra.gmra.mrb[12].mxu0 %v602_v54  ;;  %677 = vmatmul.mubr.bf16.vlgmr.msra.gmra.mrb[12].mxu1 %v602_v54 }
 0x34a   :  { %716 = vmatpush1.bf16.msra.mxu0 %v1546_v3  ;;  %757 = vmatpush1.bf16.msra.mxu1 %v1548_v4 }
 0x34b   :  { %717 = vmatprep.subr.bf16.mxu0 %v1551_v5  ;;  %758 = vmatprep.subr.bf16.mxu1 %v1555_v6 }
 0x34c   :  { %747 = vmatprep.mubr.bf16.mxu0 %v1469_v0  ;;  %788 = vmatprep.mubr.bf16.mxu1 %v1469_v0 }
 0x34e   :  { %718 = vmatpush1.bf16.msra.mxu0 %v1557_v7  ;;  %759 = vmatpush1.bf16.msra.mxu1 %v1560_v8 }
 0x34f   :  { %719 = vmatprep.subr.bf16.mxu0 %v1563_v9  ;;  %760 = vmatprep.subr.bf16.mxu1 %v1565_v10 }
 0x352   :  { %720 = vmatpush1.bf16.msra.mxu0 %v1567_v11  ;;  %761 = vmatpush1.bf16.msra.mxu1 %v1569_v12 }
 0x353   :  { %721 = vmatprep.subr.bf16.mxu0 %v1573_v13  ;;  %762 = vmatprep.subr.bf16.mxu1 %v1577_v14 }
 0x356   :  { %722 = vmatpush1.bf16.msra.mxu0 %v1579_v15  ;;  %763 = vmatpush1.bf16.msra.mxu1 %v1583_v16 }
 0x357   :  { %723 = vmatprep.subr.bf16.mxu0 %v1585_v17  ;;  %764 = vmatprep.subr.bf16.mxu1 %v1589_v18 }
 0x35a   :  { %724 = vmatpush1.bf16.msra.mxu0 %v1591_v19  ;;  %765 = vmatpush1.bf16.msra.mxu1 %v1593_v20 }
 0x35b   :  { %725 = vmatprep.subr.bf16.mxu0 %v1597_v21  ;;  %766 = vmatprep.subr.bf16.mxu1 %v1601_v22 }
 0x35e   :  { %726 = vmatpush1.bf16.msra.mxu0 %v1605_v23  ;;  %767 = vmatpush1.bf16.msra.mxu1 %v1607_v24 }
 0x35f   :  { %727 = vmatprep.subr.bf16.mxu0 %v1611_v25  ;;  %768 = vmatprep.subr.bf16.mxu1 %v1613_v26 }
 0x362   :  { %728 = vmatpush1.bf16.msra.mxu0 %v1617_v27  ;;  %769 = vmatpush1.bf16.msra.mxu1 %v1619_v28 }
 0x363   :  { %729 = vmatprep.subr.bf16.mxu0 %v1623_v29  ;;  %770 = vmatprep.subr.bf16.mxu1 %v1625_v30 }
 0x366   :  { %730 = vmatpush1.bf16.msra.mxu0 %v1629_v31  ;;  %771 = vmatpush1.bf16.msra.mxu1 %v1631_v32 }
 0x367   :  { %827 = vmatprep.subr.bf16.mxu0 %v1541_v1  ;;  %868 = vmatprep.subr.bf16.mxu1 %v1543_v2 }
 0x41c   :  { %v637_v58 = vpop.f32.mrb[12].mxu0  ;;  %v678_v59 = vpop.f32.mrb[12].mxu1 }
 0x41d   :  { %v687_v60 = vadd.f32 %v678_v59, %v600_v56  ;;  %v639_v61 = vpop.f32.mrb[13].mxu0  ;;  %v680_v62 = vpop.f32.mrb[13].mxu1  ;;  %v685_v42 = vadd.f32 %v637_v58, %v598_v63 }
 0x41e   :  { %v686_v33 = vadd.f32 %v639_v61, %v599_v57  ;;  %v641_v34 = vpop.f32.mrb[14].mxu0  ;;  %v682_v36 = vpop.f32.mrb[14].mxu1  ;;  %v688_v44 = vadd.f32 %v680_v62, %v601_v41  ;;  %v708_v61 = vld [vmem:[#allocation3 + $0x40] sm:$0xff] }
 0x41f   :  { %v691_v37 = vmul.f32 0.5, %v687_v60  ;;  %v642_v38 = vpop.f32.mrb[15].mxu0  ;;  %v683_v39 = vpop.f32.mrb[15].mxu1  ;;  %v711_v63 = vunpack.c.h.bf16 %v708_v61 }
 0x420   :  { %v690_v40 = vmul.f32 0.5, %v686_v33  ;;  %v692_v45 = vmul.f32 0.5, %v688_v44  ;;  %v710_v39 = vunpack.c.l.bf16 %v708_v61 }
 0x421   :  { %1290 = vtanh.f32 %v691_v37 }
 0x422   :  { %1292 = vtanh.f32 %v690_v40 }
 0x423   :  { %1294 = vtanh.f32 %v685_v42 }
 0x424   :  { %1296 = vtanh.f32 %v692_v45 }
 0x42b   :  { %v1291_v46 = vpop.eup %1290 }
 0x42c   :  { %v1293_v47 = vpop.eup %1292  ;;  %v697_v48 = vadd.f32 1.0, %v1291_v46 }
 0x42d   :  { %v696_v35 = vadd.f32 1.0, %v1293_v47  ;;  %v1295_v52 = vpop.eup %1294 }
 0x42e   :  { %v700_v50 = vmul.f32 0.5, %v697_v48  ;;  %v1297_v43 = vpop.eup %1296 }
 0x42f   :  { %v699_v51 = vmul.f32 0.5, %v696_v35  ;;  %v698_v56 = vadd.f32 1.0, %v1297_v43 }
 0x430   :  { %v703_v53 = vmul.f32 %v700_v50, %v1752_v49  ;;  %v709_v49 = vld [vmem:[#allocation3 + $0x48] sm:$0xff] }
 0x431   :  { %v702_v54 = vmul.f32 %v1295_v52, %v699_v51  ;;  %v701_v57 = vmul.f32 0.5, %v698_v56  ;;  %v712_v62 = vunpack.c.l.bf16 %v709_v49 }
 0x433   :  { %v1790_v55 = vadd.f32 %v703_v53, %v702_v54 }
 0x435   :  { %1298 = vtanh.f32 %v1790_v55 }
 0x43f   :  { %v1299_v58 = vpop.eup %1298 }
 0x440   :  { %v706_v59 = vmul.f32 %v1299_v58, %v701_v57 }
 0x442   :  { %v714_v60 = vpack.c.bf16 %v706_v59, %v706_v59 }
 0x444   :  { %748 = vmatmul.mubr.bf16.vlgmr.msra.gmra.mrb[16].mxu0 %v714_v60  ;;  %789 = vmatmul.mubr.bf16.vlgmr.msra.gmra.mrb[16].mxu1 %v714_v60 }
 0x445   :  { %828 = vmatpush1.bf16.msra.mxu0 %v1546_v3  ;;  %869 = vmatpush1.bf16.msra.mxu1 %v1548_v4 }
 0x446   :  { %829 = vmatprep.subr.bf16.mxu0 %v1551_v5  ;;  %870 = vmatprep.subr.bf16.mxu1 %v1555_v6 }
 0x447   :  { %859 = vmatprep.mubr.bf16.mxu0 %v1469_v0  ;;  %900 = vmatprep.mubr.bf16.mxu1 %v1469_v0 }
 0x449   :  { %830 = vmatpush1.bf16.msra.mxu0 %v1557_v7  ;;  %871 = vmatpush1.bf16.msra.mxu1 %v1560_v8 }
 0x44a   :  { %831 = vmatprep.subr.bf16.mxu0 %v1563_v9  ;;  %872 = vmatprep.subr.bf16.mxu1 %v1565_v10 }
 0x44d   :  { %832 = vmatpush1.bf16.msra.mxu0 %v1567_v11  ;;  %873 = vmatpush1.bf16.msra.mxu1 %v1569_v12 }
 0x44e   :  { %833 = vmatprep.subr.bf16.mxu0 %v1573_v13  ;;  %874 = vmatprep.subr.bf16.mxu1 %v1577_v14 }
 0x451   :  { %834 = vmatpush1.bf16.msra.mxu0 %v1579_v15  ;;  %875 = vmatpush1.bf16.msra.mxu1 %v1583_v16 }
 0x452   :  { %835 = vmatprep.subr.bf16.mxu0 %v1585_v17  ;;  %876 = vmatprep.subr.bf16.mxu1 %v1589_v18 }
 0x455   :  { %836 = vmatpush1.bf16.msra.mxu0 %v1591_v19  ;;  %877 = vmatpush1.bf16.msra.mxu1 %v1593_v20 }
 0x456   :  { %837 = vmatprep.subr.bf16.mxu0 %v1597_v21  ;;  %878 = vmatprep.subr.bf16.mxu1 %v1601_v22 }
 0x459   :  { %838 = vmatpush1.bf16.msra.mxu0 %v1605_v23  ;;  %879 = vmatpush1.bf16.msra.mxu1 %v1607_v24 }
 0x45a   :  { %839 = vmatprep.subr.bf16.mxu0 %v1611_v25  ;;  %880 = vmatprep.subr.bf16.mxu1 %v1613_v26 }
 0x45d   :  { %840 = vmatpush1.bf16.msra.mxu0 %v1617_v27  ;;  %881 = vmatpush1.bf16.msra.mxu1 %v1619_v28 }
 0x45e   :  { %841 = vmatprep.subr.bf16.mxu0 %v1623_v29  ;;  %882 = vmatprep.subr.bf16.mxu1 %v1625_v30 }
 0x461   :  { %842 = vmatpush1.bf16.msra.mxu0 %v1629_v31  ;;  %883 = vmatpush1.bf16.msra.mxu1 %v1631_v32 }
 0x462   :  { %939 = vmatprep.subr.bf16.mxu0 %v1541_v1  ;;  %980 = vmatprep.subr.bf16.mxu1 %v1543_v2  ;;  %v713_v1 = vunpack.c.h.bf16 %v709_v49 }
 0x517   :  { %v749_v33 = vpop.f32.mrb[16].mxu0  ;;  %v790_v34 = vpop.f32.mrb[16].mxu1 }
 0x518   :  { %v799_v36 = vadd.f32 %v790_v34, %v712_v62  ;;  %v751_v37 = vpop.f32.mrb[17].mxu0  ;;  %v792_v38 = vpop.f32.mrb[17].mxu1  ;;  %v797_v2 = vadd.f32 %v749_v33, %v710_v39 }
 0x519   :  { %v798_v40 = vadd.f32 %v751_v37, %v711_v63  ;;  %v753_v41 = vpop.f32.mrb[18].mxu0  ;;  %v794_v42 = vpop.f32.mrb[18].mxu1  ;;  %v800_v48 = vadd.f32 %v792_v38, %v713_v1  ;;  %v1344_v1 = vld [vmem:[#allocation6 + $0x24] ss:$16 sps:$4 sm:$0xff]  }
 0x51a   :  { %v803_v44 = vmul.f32 0.5, %v799_v36  ;;  %v754_v45 = vpop.f32.mrb[19].mxu0  ;;  %v795_v46 = vpop.f32.mrb[19].mxu1 }
 0x51b   :  { %v802_v47 = vmul.f32 0.5, %v798_v40  ;;  %v804_v35 = vmul.f32 0.5, %v800_v48  ;;  %v1342_v46 = vld [vmem:[#allocation6] ss:$16 sps:$4 sm:$0xff]  }
 0x51c   :  { %1300 = vtanh.f32 %v803_v44  ;;  %v1346_v48 = vld [vmem:[#allocation6 + $0x20] ss:$16 sps:$4 sm:$0xff]  }
 0x51d   :  { %1302 = vtanh.f32 %v802_v47  ;;  %v1343_v47 = vld [vmem:[#allocation6 + $0x8] ss:$16 sps:$4 sm:$0xff]  }
 0x51e   :  { %1304 = vtanh.f32 %v797_v2  ;;  %v1345_v2 = vld [vmem:[#allocation6 + $0x2c] ss:$16 sps:$4 sm:$0xff]  }
 0x51f   :  { %1306 = vtanh.f32 %v804_v35  ;;  %v1347_v35 = vld [vmem:[#allocation6 + $0x28] ss:$16 sps:$4 sm:$0xff]  }
 0x526   :  { %v1301_v50 = vpop.eup %1300 }
 0x527   :  { %v1303_v51 = vpop.eup %1302  ;;  %v809_v52 = vadd.f32 1.0, %v1301_v50  ;;  %v1348_v50 = vld [vmem:[#allocation6 + $0x44] ss:$16 sps:$4 sm:$0xff]  }
 0x528   :  { %v808_v53 = vadd.f32 1.0, %v1303_v51  ;;  %v1305_v56 = vpop.eup %1304  ;;  %v1349_v51 = vld [vmem:[#allocation6 + $0x4c] ss:$16 sps:$4 sm:$0xff]  }
 0x529   :  { %v812_v54 = vmul.f32 0.5, %v809_v52  ;;  %v1307_v60 = vpop.eup %1306  ;;  %v1350_v52 = vld [vmem:[#allocation6 + $0x40] ss:$16 sps:$4 sm:$0xff]  }
 0x52a   :  { %v811_v43 = vmul.f32 0.5, %v808_v53  ;;  %v810_v49 = vadd.f32 1.0, %v1307_v60  ;;  %v1351_v53 = vld [vmem:[#allocation6 + $0x48] ss:$16 sps:$4 sm:$0xff]  }
 0x52b   :  { %v815_v57 = vmul.f32 %v812_v54, %v1790_v55  ;;  %v1352_v54 = vld [vmem:[#allocation6 + $0x64] ss:$16 sps:$4 sm:$0xff]   ;;  %v1359_v60 = vld [vmem:[#allocation6 + $0x88] ss:$16 sps:$4 sm:$0xff]  }
 0x52c   :  { %v814_v58 = vmul.f32 %v1305_v56, %v811_v43  ;;  %v813_v61 = vmul.f32 0.5, %v810_v49  ;;  %v1353_v43 = vld [vmem:[#allocation6 + $0x6c] ss:$16 sps:$4 sm:$0xff]   ;;  %v1354_v56 = vld [vmem:[#allocation6 + $0x60] ss:$16 sps:$4 sm:$0xff]  }
 0x52d   :  { %v1360_v49 = vld [vmem:[#allocation6 + $0xa4] ss:$16 sps:$4 sm:$0xff]  }
 0x52e   :  { %v1828_v59 = vadd.f32 %v815_v57, %v814_v58  ;;  %v1355_v57 = vld [vmem:[#allocation6 + $0x68] ss:$16 sps:$4 sm:$0xff]   ;;  %v1357_v58 = vld [vmem:[#allocation6 + $0x8c] ss:$16 sps:$4 sm:$0xff]  }
 0x530   :  { %1308 = vtanh.f32 %v1828_v59 }
 0x53a   :  { %v1309_v62 = vpop.eup %1308 }
 0x53b   :  { %v818_v63 = vmul.f32 %v1309_v62, %v813_v61  ;;  %v1361_v61 = vld [vmem:[#allocation6 + $0xac] ss:$16 sps:$4 sm:$0xff]   ;;  %v1362_v62 = vld [vmem:[#allocation6 + $0xa0] ss:$16 sps:$4 sm:$0xff]  }
 0x53d   :  { %v826_v33 = vpack.c.bf16 %v818_v63, %v818_v63  ;;  %v1363_v63 = vld [vmem:[#allocation6 + $0xa8] ss:$16 sps:$4 sm:$0xff]  }
 0x53f   :  { %860 = vmatmul.mubr.bf16.vlgmr.msra.gmra.mrb[20].mxu0 %v826_v33  ;;  %901 = vmatmul.mubr.bf16.vlgmr.msra.gmra.mrb[20].mxu1 %v826_v33  ;;  %v1364_v33 = vld [vmem:[#allocation6 + $0xc4] ss:$16 sps:$4 sm:$0xff]  }
 0x540   :  { %940 = vmatpush1.bf16.msra.mxu0 %v1546_v3  ;;  %981 = vmatpush1.bf16.msra.mxu1 %v1548_v4  ;;  %v1340_v3 = vld [vmem:[#allocation6 + $0x4] ss:$16 sps:$4 sm:$0xff]   ;;  %v1341_v4 = vld [vmem:[#allocation6 + $0xc] ss:$16 sps:$4 sm:$0xff]  }
 0x541   :  { %941 = vmatprep.subr.bf16.mxu0 %v1551_v5  ;;  %982 = vmatprep.subr.bf16.mxu1 %v1555_v6  ;;  %v821_v5 = vld [vmem:[#allocation3 + $0x58] sm:$0xff]  ;;  %v820_v6 = vld [vmem:[#allocation3 + $0x50] sm:$0xff] }
 0x542   :  { %971 = vmatprep.mubr.bf16.mxu0 %v1469_v0  ;;  %1012 = vmatprep.mubr.bf16.mxu1 %v1469_v0 }
 0x544   :  { %942 = vmatpush1.bf16.msra.mxu0 %v1557_v7  ;;  %983 = vmatpush1.bf16.msra.mxu1 %v1560_v8  ;;  %v824_v7 = vunpack.c.l.bf16 %v821_v5  ;;  %v823_v8 = vunpack.c.h.bf16 %v820_v6 }
 0x545   :  { %943 = vmatprep.subr.bf16.mxu0 %v1563_v9  ;;  %984 = vmatprep.subr.bf16.mxu1 %v1565_v10 }
 0x548   :  { %944 = vmatpush1.bf16.msra.mxu0 %v1567_v11  ;;  %985 = vmatpush1.bf16.msra.mxu1 %v1569_v12 }
 0x549   :  { %945 = vmatprep.subr.bf16.mxu0 %v1573_v13  ;;  %986 = vmatprep.subr.bf16.mxu1 %v1577_v14  ;;  %v822_v14 = vunpack.c.l.bf16 %v820_v6  ;;  %v1368_v6 = vld [vmem:[#allocation6 + $0xe4] ss:$16 sps:$4 sm:$0xff]  }
 0x54c   :  { %946 = vmatpush1.bf16.msra.mxu0 %v1579_v15  ;;  %987 = vmatpush1.bf16.msra.mxu1 %v1583_v16 }
 0x54d   :  { %947 = vmatprep.subr.bf16.mxu0 %v1585_v17  ;;  %988 = vmatprep.subr.bf16.mxu1 %v1589_v18 }
 0x550   :  { %948 = vmatpush1.bf16.msra.mxu0 %v1591_v19  ;;  %989 = vmatpush1.bf16.msra.mxu1 %v1593_v20 }
 0x551   :  { %949 = vmatprep.subr.bf16.mxu0 %v1597_v21  ;;  %990 = vmatprep.subr.bf16.mxu1 %v1601_v22  ;;  %v825_v22 = vunpack.c.h.bf16 %v821_v5  ;;  %v1367_v5 = vld [vmem:[#allocation6 + $0xc8] ss:$16 sps:$4 sm:$0xff]  }
 0x554   :  { %950 = vmatpush1.bf16.msra.mxu0 %v1605_v23  ;;  %991 = vmatpush1.bf16.msra.mxu1 %v1607_v24 }
 0x555   :  { %951 = vmatprep.subr.bf16.mxu0 %v1611_v25  ;;  %992 = vmatprep.subr.bf16.mxu1 %v1613_v26 }
 0x558   :  { %952 = vmatpush1.bf16.msra.mxu0 %v1617_v27  ;;  %993 = vmatpush1.bf16.msra.mxu1 %v1619_v28 }
 0x559   :  { %953 = vmatprep.subr.bf16.mxu0 %v1623_v29  ;;  %994 = vmatprep.subr.bf16.mxu1 %v1625_v30 }
 0x55c   :  { %954 = vmatpush1.bf16.msra.mxu0 %v1629_v31  ;;  %995 = vmatpush1.bf16.msra.mxu1 %v1631_v32 }
 0x55d   :  { %1051 = vmatprep.subr.bf16.mxu0 %v1340_v3  ;;  %1092 = vmatprep.subr.bf16.mxu1 %v1341_v4  ;;  %v1365_v3 = vld [vmem:[#allocation6 + $0xcc] ss:$16 sps:$4 sm:$0xff]   ;;  %v1366_v4 = vld [vmem:[#allocation6 + $0xc0] ss:$16 sps:$4 sm:$0xff]  }
 0x612   :  { %v861_v9 = vpop.f32.mrb[20].mxu0  ;;  %v902_v10 = vpop.f32.mrb[20].mxu1 }
 0x613   :  { %v911_v11 = vadd.f32 %v902_v10, %v824_v7  ;;  %v863_v12 = vpop.f32.mrb[21].mxu0  ;;  %v904_v13 = vpop.f32.mrb[21].mxu1  ;;  %v909_v23 = vadd.f32 %v861_v9, %v822_v14  ;;  %v1369_v7 = vld [vmem:[#allocation6 + $0xec] ss:$16 sps:$4 sm:$0xff]   ;;  %v932_v9 = vld [vmem:[#allocation3 + $0x60] sm:$0xff] }
 0x614   :  { %v910_v15 = vadd.f32 %v863_v12, %v823_v8  ;;  %v865_v16 = vpop.f32.mrb[22].mxu0  ;;  %v906_v17 = vpop.f32.mrb[22].mxu1  ;;  %v912_v24 = vadd.f32 %v904_v13, %v825_v22  ;;  %v933_v8 = vld [vmem:[#allocation3 + $0x68] sm:$0xff] }
 0x615   :  { %v915_v18 = vmul.f32 0.5, %v911_v11  ;;  %v866_v19 = vpop.f32.mrb[23].mxu0  ;;  %v907_v20 = vpop.f32.mrb[23].mxu1  ;;  %v936_v10 = vunpack.c.l.bf16 %v933_v8  ;;  %v935_v11 = vunpack.c.h.bf16 %v932_v9  ;;  %v934_v17 = vunpack.c.l.bf16 %v932_v9 }
 0x616   :  { %v914_v21 = vmul.f32 0.5, %v910_v15  ;;  %v916_v25 = vmul.f32 0.5, %v912_v24 }
 0x617   :  { %1310 = vtanh.f32 %v915_v18 }
 0x618   :  { %1312 = vtanh.f32 %v914_v21 }
 0x619   :  { %1314 = vtanh.f32 %v909_v23 }
 0x61a   :  { %1316 = vtanh.f32 %v916_v25 }
 0x621   :  { %v1311_v26 = vpop.eup %1310 }
 0x622   :  { %v1313_v27 = vpop.eup %1312  ;;  %v921_v28 = vadd.f32 1.0, %v1311_v26 }
 0x623   :  { %v920_v29 = vadd.f32 1.0, %v1313_v27  ;;  %v1315_v34 = vpop.eup %1314 }
 0x624   :  { %v924_v30 = vmul.f32 0.5, %v921_v28  ;;  %v1317_v39 = vpop.eup %1316 }
 0x625   :  { %v923_v55 = vmul.f32 0.5, %v920_v29  ;;  %v922_v40 = vadd.f32 1.0, %v1317_v39 }
 0x626   :  { %v927_v36 = vmul.f32 %v924_v30, %v1828_v59  ;;  %v1358_v59 = vld [vmem:[#allocation6 + $0x80] ss:$16 sps:$4 sm:$0xff]  }
 0x627   :  { %v926_v37 = vmul.f32 %v1315_v34, %v923_v55  ;;  %v925_v41 = vmul.f32 0.5, %v922_v40 }
 0x629   :  { %v1864_v38 = vadd.f32 %v927_v36, %v926_v37 }
 0x62b   :  { %1318 = vtanh.f32 %v1864_v38 }
 0x635   :  { %v1319_v42 = vpop.eup %1318 }
 0x636   :  { %v930_v44 = vmul.f32 %v1319_v42, %v925_v41 }
 0x638   :  { %v938_v45 = vpack.c.bf16 %v930_v44, %v930_v44 }
 0x63a   :  { %972 = vmatmul.mubr.bf16.vlgmr.msra.gmra.mrb[24].mxu0 %v938_v45  ;;  %1013 = vmatmul.mubr.bf16.vlgmr.msra.gmra.mrb[24].mxu1 %v938_v45 }
 0x63b   :  { %1052 = vmatpush1.bf16.msra.mxu0 %v1342_v46  ;;  %1093 = vmatpush1.bf16.msra.mxu1 %v1343_v47 }
 0x63c   :  { %1053 = vmatprep.subr.bf16.mxu0 %v1344_v1  ;;  %1094 = vmatprep.subr.bf16.mxu1 %v1345_v2  ;;  %v1045_v1 = vld [vmem:[#allocation3 + $0x78] sm:$0xff]  ;;  %v1044_v2 = vld [vmem:[#allocation3 + $0x70] sm:$0xff] }
 0x63d   :  { %1083 = vmatprep.mubr.bf16.mxu0 %v1469_v0  ;;  %1124 = vmatprep.mubr.bf16.mxu1 %v1469_v0  ;;  %v1356_v0 = vld [vmem:[#allocation6 + $0x84] ss:$16 sps:$4 sm:$0xff]  }
 0x63f   :  { %1054 = vmatpush1.bf16.msra.mxu0 %v1346_v48  ;;  %1095 = vmatpush1.bf16.msra.mxu1 %v1347_v35  ;;  %v1048_v48 = vunpack.c.l.bf16 %v1045_v1  ;;  %v1047_v35 = vunpack.c.h.bf16 %v1044_v2 }
 0x640   :  { %1055 = vmatprep.subr.bf16.mxu0 %v1348_v50  ;;  %1096 = vmatprep.subr.bf16.mxu1 %v1349_v51 }
 0x643   :  { %1056 = vmatpush1.bf16.msra.mxu0 %v1350_v52  ;;  %1097 = vmatpush1.bf16.msra.mxu1 %v1351_v53 }
 0x644   :  { %1057 = vmatprep.subr.bf16.mxu0 %v1352_v54  ;;  %1098 = vmatprep.subr.bf16.mxu1 %v1353_v43  ;;  %v1046_v54 = vunpack.c.l.bf16 %v1044_v2 }
 0x647   :  { %1058 = vmatpush1.bf16.msra.mxu0 %v1354_v56  ;;  %1099 = vmatpush1.bf16.msra.mxu1 %v1355_v57 }
 0x648   :  { %1059 = vmatprep.subr.bf16.mxu0 %v1356_v0  ;;  %1100 = vmatprep.subr.bf16.mxu1 %v1357_v58 }
 0x64b   :  { %1060 = vmatpush1.bf16.msra.mxu0 %v1358_v59  ;;  %1101 = vmatpush1.bf16.msra.mxu1 %v1359_v60 }
 0x64c   :  { %1061 = vmatprep.subr.bf16.mxu0 %v1360_v49  ;;  %1102 = vmatprep.subr.bf16.mxu1 %v1361_v61  ;;  %v1049_v49 = vunpack.c.h.bf16 %v1045_v1 }
 0x64f   :  { %1062 = vmatpush1.bf16.msra.mxu0 %v1362_v62  ;;  %1103 = vmatpush1.bf16.msra.mxu1 %v1363_v63 }
 0x650   :  { %1063 = vmatprep.subr.bf16.mxu0 %v1364_v33  ;;  %1104 = vmatprep.subr.bf16.mxu1 %v1365_v3 }
 0x653   :  { %1064 = vmatpush1.bf16.msra.mxu0 %v1366_v4  ;;  %1105 = vmatpush1.bf16.msra.mxu1 %v1367_v5 }
 0x654   :  { %1065 = vmatprep.subr.bf16.mxu0 %v1368_v6  ;;  %1106 = vmatprep.subr.bf16.mxu1 %v1369_v7 }
 0x657   :  { %1066 = vmatpush1.bf16.msra.mxu0 %v1629_v31  ;;  %1107 = vmatpush1.bf16.msra.mxu1 %v1631_v32  ;;  %v937_v31 = vunpack.c.h.bf16 %v933_v8 }
 0x70d   :  { %v973_v12 = vpop.f32.mrb[24].mxu0  ;;  %v1014_v13 = vpop.f32.mrb[24].mxu1 }
 0x70e   :  { %v1023_v14 = vadd.f32 %v1014_v13, %v936_v10  ;;  %v975_v15 = vpop.f32.mrb[25].mxu0  ;;  %v1016_v16 = vpop.f32.mrb[25].mxu1  ;;  %v1021_v32 = vadd.f32 %v973_v12, %v934_v17 }
 0x70f   :  { %v1022_v18 = vadd.f32 %v975_v15, %v935_v11  ;;  %v977_v19 = vpop.f32.mrb[26].mxu0  ;;  %v1018_v20 = vpop.f32.mrb[26].mxu1  ;;  %v1024_v25 = vadd.f32 %v1016_v16, %v937_v31 }
 0x710   :  { %v1027_v21 = vmul.f32 0.5, %v1023_v14  ;;  %v978_v22 = vpop.f32.mrb[27].mxu0  ;;  %v1019_v23 = vpop.f32.mrb[27].mxu1 }
 0x711   :  { %v1026_v24 = vmul.f32 0.5, %v1022_v18  ;;  %v1028_v26 = vmul.f32 0.5, %v1024_v25 }
 0x712   :  { %1320 = vtanh.f32 %v1027_v21 }
 0x713   :  { %1322 = vtanh.f32 %v1026_v24 }
 0x714   :  { %1324 = vtanh.f32 %v1021_v32 }
 0x715   :  { %1326 = vtanh.f32 %v1028_v26 }
 0x71c   :  { %v1321_v27 = vpop.eup %1320 }
 0x71d   :  { %v1323_v28 = vpop.eup %1322  ;;  %v1033_v29 = vadd.f32 1.0, %v1321_v27 }
 0x71e   :  { %v1032_v30 = vadd.f32 1.0, %v1323_v28  ;;  %v1325_v36 = vpop.eup %1324 }
 0x71f   :  { %v1036_v55 = vmul.f32 0.5, %v1033_v29  ;;  %v1327_v41 = vpop.eup %1326 }
 0x720   :  { %v1035_v34 = vmul.f32 0.5, %v1032_v30  ;;  %v1034_v42 = vadd.f32 1.0, %v1327_v41 }
 0x721   :  { %v1039_v37 = vmul.f32 %v1036_v55, %v1864_v38 }
 0x722   :  { %v1038_v39 = vmul.f32 %v1325_v36, %v1035_v34  ;;  %v1037_v44 = vmul.f32 0.5, %v1034_v42 }
 0x724   :  { %v1040_v40 = vadd.f32 %v1039_v37, %v1038_v39 }
 0x726   :  { %1328 = vtanh.f32 %v1040_v40 }
 0x730   :  { %v1329_v45 = vpop.eup %1328 }
 0x731   :  { %v1042_v46 = vmul.f32 %v1329_v45, %v1037_v44 }
 0x733   :  { %v1050_v47 = vpack.c.bf16 %v1042_v46, %v1042_v46 }
 0x735   :  { %1084 = vmatmul.mubr.bf16.vlgmr.msra.gmra.mrb[28].mxu0 %v1050_v47  ;;  %1125 = vmatmul.mubr.bf16.vlgmr.msra.gmra.mrb[28].mxu1 %v1050_v47 }
 0x808   :  { %v1085_v50 = vpop.f32.mrb[28].mxu0  ;;  %v1126_v51 = vpop.f32.mrb[28].mxu1 }
 0x809   :  { %v1135_v52 = vadd.f32 %v1126_v51, %v1048_v48  ;;  %v1087_v53 = vpop.f32.mrb[29].mxu0  ;;  %v1128_v38 = vpop.f32.mrb[29].mxu1  ;;  %v1133_v61 = vadd.f32 %v1085_v50, %v1046_v54 }
 0x80a   :  { %v1134_v43 = vadd.f32 %v1087_v53, %v1047_v35  ;;  %v1089_v56 = vpop.f32.mrb[30].mxu0  ;;  %v1130_v57 = vpop.f32.mrb[30].mxu1  ;;  %v1136_v62 = vadd.f32 %v1128_v38, %v1049_v49 }
 0x80b   :  { %v1139_v0 = vmul.f32 0.5, %v1135_v52  ;;  %v1090_v58 = vpop.f32.mrb[31].mxu0  ;;  %v1131_v59 = vpop.f32.mrb[31].mxu1 }
 0x80c   :  { %v1138_v60 = vmul.f32 0.5, %v1134_v43  ;;  %v1140_v63 = vmul.f32 0.5, %v1136_v62 }
 0x80d   :  { %1330 = vtanh.f32 %v1139_v0 }
 0x80e   :  { %1332 = vtanh.f32 %v1138_v60 }
 0x80f   :  { %1334 = vtanh.f32 %v1133_v61 }
 0x810   :  { %1336 = vtanh.f32 %v1140_v63 }
 0x817   :  { %v1331_v33 = vpop.eup %1330 }
 0x818   :  { %v1333_v3 = vpop.eup %1332  ;;  %v1145_v4 = vadd.f32 1.0, %v1331_v33 }
 0x819   :  { %v1144_v5 = vadd.f32 1.0, %v1333_v3  ;;  %v1335_v8 = vpop.eup %1334 }
 0x81a   :  { %v1148_v6 = vmul.f32 0.5, %v1145_v4  ;;  %v1337_v12 = vpop.eup %1336 }
 0x81b   :  { %v1147_v7 = vmul.f32 0.5, %v1144_v5  ;;  %v1146_v13 = vadd.f32 1.0, %v1337_v12 }
 0x81c   :  { %v1151_v9 = vmul.f32 %v1148_v6, %v1040_v40 }
 0x81d   :  { %v1150_v10 = vmul.f32 %v1335_v8, %v1147_v7  ;;  %v1149_v14 = vmul.f32 0.5, %v1146_v13 }
 0x81f   :  { %v1152_v11 = vadd.f32 %v1151_v9, %v1150_v10 }
 0x821   :  { %1338 = vtanh.f32 %v1152_v11 }
 0x82b   :  { %v1339_v15 = vpop.eup %1338 }
 0x82c   :  { %v1154_v16 = vmul.f32 %v1339_v15, %v1149_v14 }
 0x82e   :  { %1155 = vst [vmem:[#allocation9] sm:$0xff] %v1154_v16 }
 0x82f   :  { %1447 = shalt.err (!%p1444_p0)
}
 0x830   :  { %s1448_s30 = scalar_lea.hbm %s1888_s4, 128 }
 0x831   :  { %p1449_p1 = scmp.ne.s32.totalorder %s1888_s4, %s1448_s30  ;;  %p1452_p2 = scmp.lt.u32.totalorder %s1448_s30, %s1888_s4 }
 0x833   :  { %p1454_p3 = pnand %p1452_p2, %p1449_p1 }
 0x835   :  { %1457 = shalt.err (!%p1454_p3)
}
 0x836   :  { %1166 = dma.vmem_to_hbm [thread:$0]  %s1164_s26, 128, %s1888_s4, [#allocation5]  }
 0x837   :  { %1462 = dma.done.wait [#allocation5], 128  }
 0x838   :  { %1463 = vsyncadd [#allocation5], 4294967168 }
 0x839   :  { %1170 = vsyncpa [#allocation4], 1 }
 0x83a   :  { %1171 = vsyncpa [#allocation7], 1 }
 0x83b   :  { %1172 = vsyncpa [#allocation5], 1 }

</bundles_post_ra>
